<compile_context>
chip_gen: v6e
topology: v6e:2x2x1
jax: 0.10.0
libtpu: 0.0.40
codegen_flags: <defaults>
</compile_context>

<pallas_src>
import numpy as np
import jax
import jax.numpy as jnp
from jax.experimental import pallas as pl
from jax.experimental.pallas import tpu as pltpu

EMBED_SIZE = 8                  # paras.embed_size
TARGET_NUM = 16                 # target_num
HIDDEN = EMBED_SIZE * 10        # LSTM hidden size (80)
HPAD = 128                      # hidden padded to one lane tile
BN_EPS = 1e-5


def _vmem_specs(n):
    return [pl.BlockSpec(memory_space=pltpu.MemorySpace.VMEM) for _ in range(n)]


# ---------------------------------------------------------------------------
# Fused kernel: LSTM recurrence over T steps + MLP head + log_softmax.
#   xproj : (T, B, 4*HPAD)  precomputed W_ih[target] + bias, gate order [i,f,o,g]
#   wh4   : (HPAD, 4*HPAD)  concatenated recurrent weights (zero-padded)
#   head weights already have eval-BN folded in.
# ---------------------------------------------------------------------------
def fused_kernel(xproj_ref, xnow_ref, wh4_ref,
                 wp_ref, bp_ref,
                 wn1_ref, bn1_ref, wn2_ref, bn2_ref,
                 wd1_ref, bd1_ref, wd2_ref, bd2_ref, wd3_ref, bd3_ref,
                 out_ref):
    T, B, _ = xproj_ref.shape
    HP = wh4_ref.shape[0]                       # 128
    wh4 = wh4_ref[...]                          # hoisted: loaded once

    def step(t, carry):
        h, c = carry
        # one MXU push per step on the serial path; bias already in xproj
        z = xproj_ref[t] + jnp.dot(h, wh4, preferred_element_type=jnp.float32)
        ifo = jax.nn.sigmoid(z[:, 0:3 * HP])    # i, f, o (contiguous, one EUP op)
        g = jnp.tanh(z[:, 3 * HP:4 * HP])
        i = ifo[:, 0:HP]
        f = ifo[:, HP:2 * HP]
        o = ifo[:, 2 * HP:3 * HP]
        c_new = f * c + i * g
        h_new = o * jnp.tanh(c_new)
        return (h_new, c_new)

    h0 = jnp.zeros((B, HP), jnp.float32)
    c0 = jnp.zeros((B, HP), jnp.float32)
    h, _ = jax.lax.fori_loop(0, T, step, (h0, c0), unroll=True)

    relu = lambda x: jnp.maximum(x, 0.0)

    def linear(x, w_ref, b_ref):
        return jnp.dot(x, w_ref[...], preferred_element_type=jnp.float32) + b_ref[...]

    # embed_past: Linear(+folded BN) -> ReLU   (padded h lanes are exactly 0)
    ep = relu(linear(h, wp_ref, bp_ref))

    # embed_now: Linear(+BN) -> ReLU -> Linear(+BN) -> ReLU
    en = relu(linear(xnow_ref[...], wn1_ref, bn1_ref))
    en = relu(linear(en, wn2_ref, bn2_ref))

    out = en + ep

    # decode: Linear -> ReLU -> Linear(+BN) -> ReLU -> Linear(+BN) -> ReLU
    out = relu(linear(out, wd1_ref, bd1_ref))
    out = relu(linear(out, wd2_ref, bd2_ref))
    out = relu(linear(out, wd3_ref, bd3_ref))

    # log_softmax over dim=1
    m = jnp.max(out, axis=1, keepdims=True)
    z = out - m
    out_ref[...] = z - jnp.log(jnp.sum(jnp.exp(z), axis=1, keepdims=True))


# ---------------------------------------------------------------------------
# Parameter construction (deterministic, PyTorch-style shapes).
# ---------------------------------------------------------------------------
def init_params(key):
    p = {}
    ks = iter(jax.random.split(key, 64))

    def lin(in_f, out_f):
        bound = 1.0 / np.sqrt(in_f)
        w = jax.random.uniform(next(ks), (out_f, in_f), jnp.float32, -bound, bound)
        b = jax.random.uniform(next(ks), (out_f,), jnp.float32, -bound, bound)
        return w, b

    def bn_affine(n):
        gamma = 1.0 + 0.1 * jax.random.normal(next(ks), (n,), jnp.float32)
        beta = 0.1 * jax.random.normal(next(ks), (n,), jnp.float32)
        rm = 0.1 * jax.random.normal(next(ks), (n,), jnp.float32)
        rv = jax.random.uniform(next(ks), (n,), jnp.float32, 0.5, 1.5)
        scale = gamma / jnp.sqrt(rv + BN_EPS)
        shift = beta - rm * scale
        return scale[None, :], shift[None, :]

    # LSTM (PyTorch layout: W_ih (4H, C), W_hh (4H, H), b_ih, b_hh (4H,)),
    # gate order [i, f, g, o].
    bound = 1.0 / np.sqrt(HIDDEN)
    w_ih = jax.random.uniform(next(ks), (4 * HIDDEN, TARGET_NUM), jnp.float32, -bound, bound)
    w_hh = jax.random.uniform(next(ks), (4 * HIDDEN, HIDDEN), jnp.float32, -bound, bound)
    b_ih = jax.random.uniform(next(ks), (4 * HIDDEN,), jnp.float32, -bound, bound)
    b_hh = jax.random.uniform(next(ks), (4 * HIDDEN,), jnp.float32, -bound, bound)
    bias = b_ih + b_hh
    wih_t = w_ih.T                      # (C, 4H)
    whh_t = w_hh.T                      # (H, 4H)
    p["lstm_wx"] = tuple(wih_t[:, g * HIDDEN:(g + 1) * HIDDEN] for g in range(4))
    p["lstm_wh"] = tuple(whh_t[:, g * HIDDEN:(g + 1) * HIDDEN] for g in range(4))
    p["lstm_b"] = tuple(bias[None, g * HIDDEN:(g + 1) * HIDDEN] for g in range(4))

    # embed_past: Linear(H -> E), BN(E)
    w, b = lin(HIDDEN, EMBED_SIZE)
    p["wp"], p["bp"] = w.T, b[None, :]
    p["sp"], p["tp"] = bn_affine(EMBED_SIZE)

    # embed_now: Linear(2 -> E/2), BN(E/2), Linear(E/2 -> E), BN(E)
    w, b = lin(2, EMBED_SIZE // 2)
    p["wn1"], p["bn1"] = w.T, b[None, :]
    p["sn1"], p["tn1"] = bn_affine(EMBED_SIZE // 2)
    w, b = lin(EMBED_SIZE // 2, EMBED_SIZE)
    p["wn2"], p["bn2"] = w.T, b[None, :]
    p["sn2"], p["tn2"] = bn_affine(EMBED_SIZE)

    # decode: Linear(E -> 4E), Linear(4E -> 20E), BN(20E), Linear(20E -> C), BN(C)
    w, b = lin(EMBED_SIZE, EMBED_SIZE * 4)
    p["wd1"], p["bd1"] = w.T, b[None, :]
    w, b = lin(EMBED_SIZE * 4, EMBED_SIZE * 20)
    p["wd2"], p["bd2"] = w.T, b[None, :]
    p["sd2"], p["td2"] = bn_affine(EMBED_SIZE * 20)
    w, b = lin(EMBED_SIZE * 20, TARGET_NUM)
    p["wd3"], p["bd3"] = w.T, b[None, :]
    p["sd3"], p["td3"] = bn_affine(TARGET_NUM)
    return p


def prepare_kernel_params(p):
    """Fold / pad the reference params into the kernel-friendly layout."""
    kp = {}
    # Kernel gate order [i, f, o, g] (original [i, f, g, o]) so the three
    # sigmoid gates are one contiguous lane-aligned block.
    order = (0, 1, 3, 2)
    wh4 = jnp.zeros((HPAD, 4 * HPAD), jnp.float32)
    xtab = jnp.zeros((TARGET_NUM, 4 * HPAD), jnp.float32)
    for s, g in enumerate(order):
        wh4 = wh4.at[:HIDDEN, s * HPAD:s * HPAD + HIDDEN].set(p["lstm_wh"][g])
        # one-hot @ W_ih is a row gather; pre-add the (b_ih + b_hh) bias.
        xtab = xtab.at[:, s * HPAD:s * HPAD + HIDDEN].set(p["lstm_wx"][g] + p["lstm_b"][g])
    kp["wh4"] = wh4
    kp["xtab"] = xtab

    def fold(w, b, s, t):               # eval-BN folded into Linear
        return w * s, b * s + t

    wp_pad = jnp.zeros((HPAD, EMBED_SIZE), jnp.float32).at[:HIDDEN, :].set(p["wp"])
    kp["wp"], kp["bp"] = fold(wp_pad, p["bp"], p["sp"], p["tp"])
    kp["wn1"], kp["bn1"] = fold(p["wn1"], p["bn1"], p["sn1"], p["tn1"])
    kp["wn2"], kp["bn2"] = fold(p["wn2"], p["bn2"], p["sn2"], p["tn2"])
    kp["wd1"], kp["bd1"] = p["wd1"], p["bd1"]
    kp["wd2"], kp["bd2"] = fold(p["wd2"], p["bd2"], p["sd2"], p["td2"])
    kp["wd3"], kp["bd3"] = fold(p["wd3"], p["bd3"], p["sd3"], p["td3"])
    return kp


KERNEL_ARG_KEYS = ["wh4", "wp", "bp", "wn1", "bn1", "wn2", "bn2",
                   "wd1", "bd1", "wd2", "bd2", "wd3", "bd3"]


def seq_embed_time_forward(kparams, inputs, targets):
    B = targets.shape[0]
    # refineInput_onehot + input projection collapse to an embedding gather
    # (time-major so the kernel slices timestep t along the leading axis).
    xproj = jnp.take(kparams["xtab"], targets.T, axis=0)      # (T, B, 4*HPAD)
    x_now = inputs[:, -1, :2].astype(jnp.float32)             # (B, 2)

    args = (xproj, x_now, *(kparams[k] for k in KERNEL_ARG_KEYS))
    out = pl.pallas_call(
        fused_kernel,
        out_shape=jax.ShapeDtypeStruct((B, TARGET_NUM), jnp.float32),
        in_specs=_vmem_specs(len(args)),
        out_specs=pl.BlockSpec(memory_space=pltpu.MemorySpace.VMEM),
    )(*args)
    return out


# Pure-JAX reference (original, un-fused math) for verification.
def reference_forward(params, inputs, targets):
    onehot = jax.nn.one_hot(targets, TARGET_NUM, dtype=jnp.float32)
    B, T, _ = onehot.shape
    h = jnp.zeros((B, HIDDEN), jnp.float32)
    c = jnp.zeros((B, HIDDEN), jnp.float32)
    wx, wh, bb = params["lstm_wx"], params["lstm_wh"], params["lstm_b"]
    for t in range(T):
        x_t = onehot[:, t, :]
        i = jax.nn.sigmoid(x_t @ wx[0] + h @ wh[0] + bb[0])
        f = jax.nn.sigmoid(x_t @ wx[1] + h @ wh[1] + bb[1])
        g = jnp.tanh(x_t @ wx[2] + h @ wh[2] + bb[2])
        o = jax.nn.sigmoid(x_t @ wx[3] + h @ wh[3] + bb[3])
        c = f * c + i * g
        h = o * jnp.tanh(c)
    relu = lambda x: jnp.maximum(x, 0.0)
    ep = relu((h @ params["wp"] + params["bp"]) * params["sp"] + params["tp"])
    xn = inputs[:, -1, :2]
    en = relu((xn @ params["wn1"] + params["bn1"]) * params["sn1"] + params["tn1"])
    en = relu((en @ params["wn2"] + params["bn2"]) * params["sn2"] + params["tn2"])
    out = en + ep
    out = relu(out @ params["wd1"] + params["bd1"])
    out = relu((out @ params["wd2"] + params["bd2"]) * params["sd2"] + params["td2"])
    out = relu((out @ params["wd3"] + params["bd3"]) * params["sd3"] + params["td3"])
    return jax.nn.log_softmax(out, axis=1)


if __name__ == "__main__":
    key = jax.random.PRNGKey(0)
    kpkey, ki, kt = jax.random.split(key, 3)
    params = init_params(kpkey)
    kparams = prepare_kernel_params(params)

    B, T_in, F, T = 2, 8, 4, 8
    inputs = jax.random.normal(ki, (B, T_in, F), jnp.float32)
    targets = jax.random.randint(kt, (B, T), 0, TARGET_NUM, dtype=jnp.int32)

    out = jax.jit(seq_embed_time_forward)(kparams, inputs, targets)
    out = jax.block_until_ready(out)

    ref = reference_forward(params, inputs, targets)
    assert out.shape == (B, TARGET_NUM)
    assert bool(jnp.allclose(out, ref, atol=2e-4, rtol=2e-4)), \
        float(jnp.max(jnp.abs(out - ref)))
    print("KERNEL_OK")
</pallas_src>

<mosaic_0001>
module attributes {stable_mosaic.version = 11 : i64} {
  func.func @fused_kernel(%arg0: memref<8x2x512xf32, #tpu.memory_space<vmem>>, %arg1: memref<2x2xf32, #tpu.memory_space<vmem>>, %arg2: memref<128x512xf32, #tpu.memory_space<vmem>>, %arg3: memref<128x8xf32, #tpu.memory_space<vmem>>, %arg4: memref<1x8xf32, #tpu.memory_space<vmem>>, %arg5: memref<2x4xf32, #tpu.memory_space<vmem>>, %arg6: memref<1x4xf32, #tpu.memory_space<vmem>>, %arg7: memref<4x8xf32, #tpu.memory_space<vmem>>, %arg8: memref<1x8xf32, #tpu.memory_space<vmem>>, %arg9: memref<8x32xf32, #tpu.memory_space<vmem>>, %arg10: memref<1x32xf32, #tpu.memory_space<vmem>>, %arg11: memref<32x160xf32, #tpu.memory_space<vmem>>, %arg12: memref<1x160xf32, #tpu.memory_space<vmem>>, %arg13: memref<160x16xf32, #tpu.memory_space<vmem>>, %arg14: memref<1x16xf32, #tpu.memory_space<vmem>>, %arg15: memref<2x16xf32, #tpu.memory_space<vmem>>) attributes {dimension_semantics = [], scalar_prefetch = 0 : i64, scratch_operands = 0 : i64, tpu.core_type = #tpu.core_type<tc>} {
    %c0 = arith.constant 0 : index
    %c0_0 = arith.constant 0 : index
    %0 = vector.load %arg2[%c0, %c0_0] : memref<128x512xf32, #tpu.memory_space<vmem>>, vector<128x512xf32>
    %cst = arith.constant 0.000000e+00 : f32
    %1 = vector.broadcast %cst : f32 to vector<2x128xf32>
    %cst_1 = arith.constant 0.000000e+00 : f32
    %2 = vector.broadcast %cst_1 : f32 to vector<2x128xf32>
    %c0_i32 = arith.constant 0 : i32
    %3 = arith.index_cast %c0_i32 : i32 to index
    %c0_2 = arith.constant 0 : index
    %c0_3 = arith.constant 0 : index
    %4 = vector.load %arg0[%3, %c0_2, %c0_3] : memref<8x2x512xf32, #tpu.memory_space<vmem>>, vector<1x2x512xf32>
    %5 = vector.shape_cast %4 : vector<1x2x512xf32> to vector<2x512xf32>
    %cst_4 = arith.constant dense<0.000000e+00> : vector<2x512xf32>
    %6 = tpu.matmul %1, %0, %cst_4 {dimension_numbers = #tpu.dot_dimension_numbers<[1], [0], [0], [1], [0, 0, 1, 1], [], []>} : vector<2x128xf32>, vector<128x512xf32>, vector<2x512xf32> -> vector<2x512xf32>
    %7 = arith.addf %5, %6 : vector<2x512xf32>
    %8 = vector.extract_strided_slice %7 {offsets = [0, 0], sizes = [2, 384], strides = [1, 1]} : vector<2x512xf32> to vector<2x384xf32>
    %9 = arith.negf %8 : vector<2x384xf32>
    %10 = math.exp %9 : vector<2x384xf32>
    %cst_5 = arith.constant 1.000000e+00 : f32
    %11 = vector.broadcast %cst_5 : f32 to vector<2x384xf32>
    %12 = arith.addf %11, %10 : vector<2x384xf32>
    %13 = arith.divf %11, %12 : vector<2x384xf32>
    %14 = vector.extract_strided_slice %7 {offsets = [0, 384], sizes = [2, 128], strides = [1, 1]} : vector<2x512xf32> to vector<2x128xf32>
    %15 = math.tanh %14 : vector<2x128xf32>
    %16 = vector.extract_strided_slice %13 {offsets = [0, 0], sizes = [2, 128], strides = [1, 1]} : vector<2x384xf32> to vector<2x128xf32>
    %17 = vector.extract_strided_slice %13 {offsets = [0, 128], sizes = [2, 128], strides = [1, 1]} : vector<2x384xf32> to vector<2x128xf32>
    %18 = vector.extract_strided_slice %13 {offsets = [0, 256], sizes = [2, 128], strides = [1, 1]} : vector<2x384xf32> to vector<2x128xf32>
    %19 = arith.mulf %17, %2 : vector<2x128xf32>
    %20 = arith.mulf %16, %15 : vector<2x128xf32>
    %21 = arith.addf %19, %20 : vector<2x128xf32>
    %22 = math.tanh %21 : vector<2x128xf32>
    %23 = arith.mulf %18, %22 : vector<2x128xf32>
    %c1_i32 = arith.constant 1 : i32
    %24 = arith.index_cast %c1_i32 : i32 to index
    %c0_6 = arith.constant 0 : index
    %c0_7 = arith.constant 0 : index
    %25 = vector.load %arg0[%24, %c0_6, %c0_7] : memref<8x2x512xf32, #tpu.memory_space<vmem>>, vector<1x2x512xf32>
    %26 = vector.shape_cast %25 : vector<1x2x512xf32> to vector<2x512xf32>
    %cst_8 = arith.constant dense<0.000000e+00> : vector<2x512xf32>
    %27 = tpu.matmul %23, %0, %cst_8 {dimension_numbers = #tpu.dot_dimension_numbers<[1], [0], [0], [1], [0, 0, 1, 1], [], []>} : vector<2x128xf32>, vector<128x512xf32>, vector<2x512xf32> -> vector<2x512xf32>
    %28 = arith.addf %26, %27 : vector<2x512xf32>
    %29 = vector.extract_strided_slice %28 {offsets = [0, 0], sizes = [2, 384], strides = [1, 1]} : vector<2x512xf32> to vector<2x384xf32>
    %30 = arith.negf %29 : vector<2x384xf32>
    %31 = math.exp %30 : vector<2x384xf32>
    %cst_9 = arith.constant 1.000000e+00 : f32
    %32 = vector.broadcast %cst_9 : f32 to vector<2x384xf32>
    %33 = arith.addf %32, %31 : vector<2x384xf32>
    %34 = arith.divf %32, %33 : vector<2x384xf32>
    %35 = vector.extract_strided_slice %28 {offsets = [0, 384], sizes = [2, 128], strides = [1, 1]} : vector<2x512xf32> to vector<2x128xf32>
    %36 = math.tanh %35 : vector<2x128xf32>
    %37 = vector.extract_strided_slice %34 {offsets = [0, 0], sizes = [2, 128], strides = [1, 1]} : vector<2x384xf32> to vector<2x128xf32>
    %38 = vector.extract_strided_slice %34 {offsets = [0, 128], sizes = [2, 128], strides = [1, 1]} : vector<2x384xf32> to vector<2x128xf32>
    %39 = vector.extract_strided_slice %34 {offsets = [0, 256], sizes = [2, 128], strides = [1, 1]} : vector<2x384xf32> to vector<2x128xf32>
    %40 = arith.mulf %38, %21 : vector<2x128xf32>
    %41 = arith.mulf %37, %36 : vector<2x128xf32>
    %42 = arith.addf %40, %41 : vector<2x128xf32>
    %43 = math.tanh %42 : vector<2x128xf32>
    %44 = arith.mulf %39, %43 : vector<2x128xf32>
    %c2_i32 = arith.constant 2 : i32
    %45 = arith.index_cast %c2_i32 : i32 to index
    %c0_10 = arith.constant 0 : index
    %c0_11 = arith.constant 0 : index
    %46 = vector.load %arg0[%45, %c0_10, %c0_11] : memref<8x2x512xf32, #tpu.memory_space<vmem>>, vector<1x2x512xf32>
    %47 = vector.shape_cast %46 : vector<1x2x512xf32> to vector<2x512xf32>
    %cst_12 = arith.constant dense<0.000000e+00> : vector<2x512xf32>
    %48 = tpu.matmul %44, %0, %cst_12 {dimension_numbers = #tpu.dot_dimension_numbers<[1], [0], [0], [1], [0, 0, 1, 1], [], []>} : vector<2x128xf32>, vector<128x512xf32>, vector<2x512xf32> -> vector<2x512xf32>
    %49 = arith.addf %47, %48 : vector<2x512xf32>
    %50 = vector.extract_strided_slice %49 {offsets = [0, 0], sizes = [2, 384], strides = [1, 1]} : vector<2x512xf32> to vector<2x384xf32>
    %51 = arith.negf %50 : vector<2x384xf32>
    %52 = math.exp %51 : vector<2x384xf32>
    %cst_13 = arith.constant 1.000000e+00 : f32
    %53 = vector.broadcast %cst_13 : f32 to vector<2x384xf32>
    %54 = arith.addf %53, %52 : vector<2x384xf32>
    %55 = arith.divf %53, %54 : vector<2x384xf32>
    %56 = vector.extract_strided_slice %49 {offsets = [0, 384], sizes = [2, 128], strides = [1, 1]} : vector<2x512xf32> to vector<2x128xf32>
    %57 = math.tanh %56 : vector<2x128xf32>
    %58 = vector.extract_strided_slice %55 {offsets = [0, 0], sizes = [2, 128], strides = [1, 1]} : vector<2x384xf32> to vector<2x128xf32>
    %59 = vector.extract_strided_slice %55 {offsets = [0, 128], sizes = [2, 128], strides = [1, 1]} : vector<2x384xf32> to vector<2x128xf32>
    %60 = vector.extract_strided_slice %55 {offsets = [0, 256], sizes = [2, 128], strides = [1, 1]} : vector<2x384xf32> to vector<2x128xf32>
    %61 = arith.mulf %59, %42 : vector<2x128xf32>
    %62 = arith.mulf %58, %57 : vector<2x128xf32>
    %63 = arith.addf %61, %62 : vector<2x128xf32>
    %64 = math.tanh %63 : vector<2x128xf32>
    %65 = arith.mulf %60, %64 : vector<2x128xf32>
    %c3_i32 = arith.constant 3 : i32
    %66 = arith.index_cast %c3_i32 : i32 to index
    %c0_14 = arith.constant 0 : index
    %c0_15 = arith.constant 0 : index
    %67 = vector.load %arg0[%66, %c0_14, %c0_15] : memref<8x2x512xf32, #tpu.memory_space<vmem>>, vector<1x2x512xf32>
    %68 = vector.shape_cast %67 : vector<1x2x512xf32> to vector<2x512xf32>
    %cst_16 = arith.constant dense<0.000000e+00> : vector<2x512xf32>
    %69 = tpu.matmul %65, %0, %cst_16 {dimension_numbers = #tpu.dot_dimension_numbers<[1], [0], [0], [1], [0, 0, 1, 1], [], []>} : vector<2x128xf32>, vector<128x512xf32>, vector<2x512xf32> -> vector<2x512xf32>
    %70 = arith.addf %68, %69 : vector<2x512xf32>
    %71 = vector.extract_strided_slice %70 {offsets = [0, 0], sizes = [2, 384], strides = [1, 1]} : vector<2x512xf32> to vector<2x384xf32>
    %72 = arith.negf %71 : vector<2x384xf32>
    %73 = math.exp %72 : vector<2x384xf32>
    %cst_17 = arith.constant 1.000000e+00 : f32
    %74 = vector.broadcast %cst_17 : f32 to vector<2x384xf32>
    %75 = arith.addf %74, %73 : vector<2x384xf32>
    %76 = arith.divf %74, %75 : vector<2x384xf32>
    %77 = vector.extract_strided_slice %70 {offsets = [0, 384], sizes = [2, 128], strides = [1, 1]} : vector<2x512xf32> to vector<2x128xf32>
    %78 = math.tanh %77 : vector<2x128xf32>
    %79 = vector.extract_strided_slice %76 {offsets = [0, 0], sizes = [2, 128], strides = [1, 1]} : vector<2x384xf32> to vector<2x128xf32>
    %80 = vector.extract_strided_slice %76 {offsets = [0, 128], sizes = [2, 128], strides = [1, 1]} : vector<2x384xf32> to vector<2x128xf32>
    %81 = vector.extract_strided_slice %76 {offsets = [0, 256], sizes = [2, 128], strides = [1, 1]} : vector<2x384xf32> to vector<2x128xf32>
    %82 = arith.mulf %80, %63 : vector<2x128xf32>
    %83 = arith.mulf %79, %78 : vector<2x128xf32>
    %84 = arith.addf %82, %83 : vector<2x128xf32>
    %85 = math.tanh %84 : vector<2x128xf32>
    %86 = arith.mulf %81, %85 : vector<2x128xf32>
    %c4_i32 = arith.constant 4 : i32
    %87 = arith.index_cast %c4_i32 : i32 to index
    %c0_18 = arith.constant 0 : index
    %c0_19 = arith.constant 0 : index
    %88 = vector.load %arg0[%87, %c0_18, %c0_19] : memref<8x2x512xf32, #tpu.memory_space<vmem>>, vector<1x2x512xf32>
    %89 = vector.shape_cast %88 : vector<1x2x512xf32> to vector<2x512xf32>
    %cst_20 = arith.constant dense<0.000000e+00> : vector<2x512xf32>
    %90 = tpu.matmul %86, %0, %cst_20 {dimension_numbers = #tpu.dot_dimension_numbers<[1], [0], [0], [1], [0, 0, 1, 1], [], []>} : vector<2x128xf32>, vector<128x512xf32>, vector<2x512xf32> -> vector<2x512xf32>
    %91 = arith.addf %89, %90 : vector<2x512xf32>
    %92 = vector.extract_strided_slice %91 {offsets = [0, 0], sizes = [2, 384], strides = [1, 1]} : vector<2x512xf32> to vector<2x384xf32>
    %93 = arith.negf %92 : vector<2x384xf32>
    %94 = math.exp %93 : vector<2x384xf32>
    %cst_21 = arith.constant 1.000000e+00 : f32
    %95 = vector.broadcast %cst_21 : f32 to vector<2x384xf32>
    %96 = arith.addf %95, %94 : vector<2x384xf32>
    %97 = arith.divf %95, %96 : vector<2x384xf32>
    %98 = vector.extract_strided_slice %91 {offsets = [0, 384], sizes = [2, 128], strides = [1, 1]} : vector<2x512xf32> to vector<2x128xf32>
    %99 = math.tanh %98 : vector<2x128xf32>
    %100 = vector.extract_strided_slice %97 {offsets = [0, 0], sizes = [2, 128], strides = [1, 1]} : vector<2x384xf32> to vector<2x128xf32>
    %101 = vector.extract_strided_slice %97 {offsets = [0, 128], sizes = [2, 128], strides = [1, 1]} : vector<2x384xf32> to vector<2x128xf32>
    %102 = vector.extract_strided_slice %97 {offsets = [0, 256], sizes = [2, 128], strides = [1, 1]} : vector<2x384xf32> to vector<2x128xf32>
    %103 = arith.mulf %101, %84 : vector<2x128xf32>
    %104 = arith.mulf %100, %99 : vector<2x128xf32>
    %105 = arith.addf %103, %104 : vector<2x128xf32>
    %106 = math.tanh %105 : vector<2x128xf32>
    %107 = arith.mulf %102, %106 : vector<2x128xf32>
    %c5_i32 = arith.constant 5 : i32
    %108 = arith.index_cast %c5_i32 : i32 to index
    %c0_22 = arith.constant 0 : index
    %c0_23 = arith.constant 0 : index
    %109 = vector.load %arg0[%108, %c0_22, %c0_23] : memref<8x2x512xf32, #tpu.memory_space<vmem>>, vector<1x2x512xf32>
    %110 = vector.shape_cast %109 : vector<1x2x512xf32> to vector<2x512xf32>
    %cst_24 = arith.constant dense<0.000000e+00> : vector<2x512xf32>
    %111 = tpu.matmul %107, %0, %cst_24 {dimension_numbers = #tpu.dot_dimension_numbers<[1], [0], [0], [1], [0, 0, 1, 1], [], []>} : vector<2x128xf32>, vector<128x512xf32>, vector<2x512xf32> -> vector<2x512xf32>
    %112 = arith.addf %110, %111 : vector<2x512xf32>
    %113 = vector.extract_strided_slice %112 {offsets = [0, 0], sizes = [2, 384], strides = [1, 1]} : vector<2x512xf32> to vector<2x384xf32>
    %114 = arith.negf %113 : vector<2x384xf32>
    %115 = math.exp %114 : vector<2x384xf32>
    %cst_25 = arith.constant 1.000000e+00 : f32
    %116 = vector.broadcast %cst_25 : f32 to vector<2x384xf32>
    %117 = arith.addf %116, %115 : vector<2x384xf32>
    %118 = arith.divf %116, %117 : vector<2x384xf32>
    %119 = vector.extract_strided_slice %112 {offsets = [0, 384], sizes = [2, 128], strides = [1, 1]} : vector<2x512xf32> to vector<2x128xf32>
    %120 = math.tanh %119 : vector<2x128xf32>
    %121 = vector.extract_strided_slice %118 {offsets = [0, 0], sizes = [2, 128], strides = [1, 1]} : vector<2x384xf32> to vector<2x128xf32>
    %122 = vector.extract_strided_slice %118 {offsets = [0, 128], sizes = [2, 128], strides = [1, 1]} : vector<2x384xf32> to vector<2x128xf32>
    %123 = vector.extract_strided_slice %118 {offsets = [0, 256], sizes = [2, 128], strides = [1, 1]} : vector<2x384xf32> to vector<2x128xf32>
    %124 = arith.mulf %122, %105 : vector<2x128xf32>
    %125 = arith.mulf %121, %120 : vector<2x128xf32>
    %126 = arith.addf %124, %125 : vector<2x128xf32>
    %127 = math.tanh %126 : vector<2x128xf32>
    %128 = arith.mulf %123, %127 : vector<2x128xf32>
    %c6_i32 = arith.constant 6 : i32
    %129 = arith.index_cast %c6_i32 : i32 to index
    %c0_26 = arith.constant 0 : index
    %c0_27 = arith.constant 0 : index
    %130 = vector.load %arg0[%129, %c0_26, %c0_27] : memref<8x2x512xf32, #tpu.memory_space<vmem>>, vector<1x2x512xf32>
    %131 = vector.shape_cast %130 : vector<1x2x512xf32> to vector<2x512xf32>
    %cst_28 = arith.constant dense<0.000000e+00> : vector<2x512xf32>
    %132 = tpu.matmul %128, %0, %cst_28 {dimension_numbers = #tpu.dot_dimension_numbers<[1], [0], [0], [1], [0, 0, 1, 1], [], []>} : vector<2x128xf32>, vector<128x512xf32>, vector<2x512xf32> -> vector<2x512xf32>
    %133 = arith.addf %131, %132 : vector<2x512xf32>
    %134 = vector.extract_strided_slice %133 {offsets = [0, 0], sizes = [2, 384], strides = [1, 1]} : vector<2x512xf32> to vector<2x384xf32>
    %135 = arith.negf %134 : vector<2x384xf32>
    %136 = math.exp %135 : vector<2x384xf32>
    %cst_29 = arith.constant 1.000000e+00 : f32
    %137 = vector.broadcast %cst_29 : f32 to vector<2x384xf32>
    %138 = arith.addf %137, %136 : vector<2x384xf32>
    %139 = arith.divf %137, %138 : vector<2x384xf32>
    %140 = vector.extract_strided_slice %133 {offsets = [0, 384], sizes = [2, 128], strides = [1, 1]} : vector<2x512xf32> to vector<2x128xf32>
    %141 = math.tanh %140 : vector<2x128xf32>
    %142 = vector.extract_strided_slice %139 {offsets = [0, 0], sizes = [2, 128], strides = [1, 1]} : vector<2x384xf32> to vector<2x128xf32>
    %143 = vector.extract_strided_slice %139 {offsets = [0, 128], sizes = [2, 128], strides = [1, 1]} : vector<2x384xf32> to vector<2x128xf32>
    %144 = vector.extract_strided_slice %139 {offsets = [0, 256], sizes = [2, 128], strides = [1, 1]} : vector<2x384xf32> to vector<2x128xf32>
    %145 = arith.mulf %143, %126 : vector<2x128xf32>
    %146 = arith.mulf %142, %141 : vector<2x128xf32>
    %147 = arith.addf %145, %146 : vector<2x128xf32>
    %148 = math.tanh %147 : vector<2x128xf32>
    %149 = arith.mulf %144, %148 : vector<2x128xf32>
    %c7_i32 = arith.constant 7 : i32
    %150 = arith.index_cast %c7_i32 : i32 to index
    %c0_30 = arith.constant 0 : index
    %c0_31 = arith.constant 0 : index
    %151 = vector.load %arg0[%150, %c0_30, %c0_31] : memref<8x2x512xf32, #tpu.memory_space<vmem>>, vector<1x2x512xf32>
    %152 = vector.shape_cast %151 : vector<1x2x512xf32> to vector<2x512xf32>
    %cst_32 = arith.constant dense<0.000000e+00> : vector<2x512xf32>
    %153 = tpu.matmul %149, %0, %cst_32 {dimension_numbers = #tpu.dot_dimension_numbers<[1], [0], [0], [1], [0, 0, 1, 1], [], []>} : vector<2x128xf32>, vector<128x512xf32>, vector<2x512xf32> -> vector<2x512xf32>
    %154 = arith.addf %152, %153 : vector<2x512xf32>
    %155 = vector.extract_strided_slice %154 {offsets = [0, 0], sizes = [2, 384], strides = [1, 1]} : vector<2x512xf32> to vector<2x384xf32>
    %156 = arith.negf %155 : vector<2x384xf32>
    %157 = math.exp %156 : vector<2x384xf32>
    %cst_33 = arith.constant 1.000000e+00 : f32
    %158 = vector.broadcast %cst_33 : f32 to vector<2x384xf32>
    %159 = arith.addf %158, %157 : vector<2x384xf32>
    %160 = arith.divf %158, %159 : vector<2x384xf32>
    %161 = vector.extract_strided_slice %154 {offsets = [0, 384], sizes = [2, 128], strides = [1, 1]} : vector<2x512xf32> to vector<2x128xf32>
    %162 = math.tanh %161 : vector<2x128xf32>
    %163 = vector.extract_strided_slice %160 {offsets = [0, 0], sizes = [2, 128], strides = [1, 1]} : vector<2x384xf32> to vector<2x128xf32>
    %164 = vector.extract_strided_slice %160 {offsets = [0, 128], sizes = [2, 128], strides = [1, 1]} : vector<2x384xf32> to vector<2x128xf32>
    %165 = vector.extract_strided_slice %160 {offsets = [0, 256], sizes = [2, 128], strides = [1, 1]} : vector<2x384xf32> to vector<2x128xf32>
    %166 = arith.mulf %164, %147 : vector<2x128xf32>
    %167 = arith.mulf %163, %162 : vector<2x128xf32>
    %168 = arith.addf %166, %167 : vector<2x128xf32>
    %169 = math.tanh %168 : vector<2x128xf32>
    %170 = arith.mulf %165, %169 : vector<2x128xf32>
    %c8_i32 = arith.constant 8 : i32
    %c0_34 = arith.constant 0 : index
    %c0_35 = arith.constant 0 : index
    %171 = vector.load %arg3[%c0_34, %c0_35] : memref<128x8xf32, #tpu.memory_space<vmem>>, vector<128x8xf32>
    %cst_36 = arith.constant dense<0.000000e+00> : vector<2x8xf32>
    %172 = tpu.matmul %170, %171, %cst_36 {dimension_numbers = #tpu.dot_dimension_numbers<[1], [0], [0], [1], [0, 0, 1, 1], [], []>} : vector<2x128xf32>, vector<128x8xf32>, vector<2x8xf32> -> vector<2x8xf32>
    %c0_37 = arith.constant 0 : index
    %c0_38 = arith.constant 0 : index
    %173 = vector.load %arg4[%c0_37, %c0_38] : memref<1x8xf32, #tpu.memory_space<vmem>>, vector<1x8xf32>
    %174 = vector.broadcast %173 : vector<1x8xf32> to vector<2x8xf32>
    %175 = arith.addf %172, %174 : vector<2x8xf32>
    %cst_39 = arith.constant 0.000000e+00 : f32
    %176 = vector.broadcast %cst_39 : f32 to vector<2x8xf32>
    %177 = arith.maximumf %175, %176 : vector<2x8xf32>
    %c0_40 = arith.constant 0 : index
    %c0_41 = arith.constant 0 : index
    %178 = vector.load %arg1[%c0_40, %c0_41] : memref<2x2xf32, #tpu.memory_space<vmem>>, vector<2x2xf32>
    %c0_42 = arith.constant 0 : index
    %c0_43 = arith.constant 0 : index
    %179 = vector.load %arg5[%c0_42, %c0_43] : memref<2x4xf32, #tpu.memory_space<vmem>>, vector<2x4xf32>
    %cst_44 = arith.constant dense<0.000000e+00> : vector<2x4xf32>
    %180 = tpu.matmul %178, %179, %cst_44 {dimension_numbers = #tpu.dot_dimension_numbers<[1], [0], [0], [1], [0, 0, 1, 1], [], []>} : vector<2x2xf32>, vector<2x4xf32>, vector<2x4xf32> -> vector<2x4xf32>
    %c0_45 = arith.constant 0 : index
    %c0_46 = arith.constant 0 : index
    %181 = vector.load %arg6[%c0_45, %c0_46] : memref<1x4xf32, #tpu.memory_space<vmem>>, vector<1x4xf32>
    %182 = vector.broadcast %181 : vector<1x4xf32> to vector<2x4xf32>
    %183 = arith.addf %180, %182 : vector<2x4xf32>
    %cst_47 = arith.constant 0.000000e+00 : f32
    %184 = vector.broadcast %cst_47 : f32 to vector<2x4xf32>
    %185 = arith.maximumf %183, %184 : vector<2x4xf32>
    %c0_48 = arith.constant 0 : index
    %c0_49 = arith.constant 0 : index
    %186 = vector.load %arg7[%c0_48, %c0_49] : memref<4x8xf32, #tpu.memory_space<vmem>>, vector<4x8xf32>
    %cst_50 = arith.constant dense<0.000000e+00> : vector<2x8xf32>
    %187 = tpu.matmul %185, %186, %cst_50 {dimension_numbers = #tpu.dot_dimension_numbers<[1], [0], [0], [1], [0, 0, 1, 1], [], []>} : vector<2x4xf32>, vector<4x8xf32>, vector<2x8xf32> -> vector<2x8xf32>
    %c0_51 = arith.constant 0 : index
    %c0_52 = arith.constant 0 : index
    %188 = vector.load %arg8[%c0_51, %c0_52] : memref<1x8xf32, #tpu.memory_space<vmem>>, vector<1x8xf32>
    %189 = vector.broadcast %188 : vector<1x8xf32> to vector<2x8xf32>
    %190 = arith.addf %187, %189 : vector<2x8xf32>
    %cst_53 = arith.constant 0.000000e+00 : f32
    %191 = vector.broadcast %cst_53 : f32 to vector<2x8xf32>
    %192 = arith.maximumf %190, %191 : vector<2x8xf32>
    %193 = arith.addf %192, %177 : vector<2x8xf32>
    %c0_54 = arith.constant 0 : index
    %c0_55 = arith.constant 0 : index
    %194 = vector.load %arg9[%c0_54, %c0_55] : memref<8x32xf32, #tpu.memory_space<vmem>>, vector<8x32xf32>
    %cst_56 = arith.constant dense<0.000000e+00> : vector<2x32xf32>
    %195 = tpu.matmul %193, %194, %cst_56 {dimension_numbers = #tpu.dot_dimension_numbers<[1], [0], [0], [1], [0, 0, 1, 1], [], []>} : vector<2x8xf32>, vector<8x32xf32>, vector<2x32xf32> -> vector<2x32xf32>
    %c0_57 = arith.constant 0 : index
    %c0_58 = arith.constant 0 : index
    %196 = vector.load %arg10[%c0_57, %c0_58] : memref<1x32xf32, #tpu.memory_space<vmem>>, vector<1x32xf32>
    %197 = vector.broadcast %196 : vector<1x32xf32> to vector<2x32xf32>
    %198 = arith.addf %195, %197 : vector<2x32xf32>
    %cst_59 = arith.constant 0.000000e+00 : f32
    %199 = vector.broadcast %cst_59 : f32 to vector<2x32xf32>
    %200 = arith.maximumf %198, %199 : vector<2x32xf32>
    %c0_60 = arith.constant 0 : index
    %c0_61 = arith.constant 0 : index
    %201 = vector.load %arg11[%c0_60, %c0_61] : memref<32x160xf32, #tpu.memory_space<vmem>>, vector<32x160xf32>
    %cst_62 = arith.constant dense<0.000000e+00> : vector<2x160xf32>
    %202 = tpu.matmul %200, %201, %cst_62 {dimension_numbers = #tpu.dot_dimension_numbers<[1], [0], [0], [1], [0, 0, 1, 1], [], []>} : vector<2x32xf32>, vector<32x160xf32>, vector<2x160xf32> -> vector<2x160xf32>
    %c0_63 = arith.constant 0 : index
    %c0_64 = arith.constant 0 : index
    %203 = vector.load %arg12[%c0_63, %c0_64] : memref<1x160xf32, #tpu.memory_space<vmem>>, vector<1x160xf32>
    %204 = vector.broadcast %203 : vector<1x160xf32> to vector<2x160xf32>
    %205 = arith.addf %202, %204 : vector<2x160xf32>
    %cst_65 = arith.constant 0.000000e+00 : f32
    %206 = vector.broadcast %cst_65 : f32 to vector<2x160xf32>
    %207 = arith.maximumf %205, %206 : vector<2x160xf32>
    %c0_66 = arith.constant 0 : index
    %c0_67 = arith.constant 0 : index
    %208 = vector.load %arg13[%c0_66, %c0_67] : memref<160x16xf32, #tpu.memory_space<vmem>>, vector<160x16xf32>
    %cst_68 = arith.constant dense<0.000000e+00> : vector<2x16xf32>
    %209 = tpu.matmul %207, %208, %cst_68 {dimension_numbers = #tpu.dot_dimension_numbers<[1], [0], [0], [1], [0, 0, 1, 1], [], []>} : vector<2x160xf32>, vector<160x16xf32>, vector<2x16xf32> -> vector<2x16xf32>
    %c0_69 = arith.constant 0 : index
    %c0_70 = arith.constant 0 : index
    %210 = vector.load %arg14[%c0_69, %c0_70] : memref<1x16xf32, #tpu.memory_space<vmem>>, vector<1x16xf32>
    %211 = vector.broadcast %210 : vector<1x16xf32> to vector<2x16xf32>
    %212 = arith.addf %209, %211 : vector<2x16xf32>
    %cst_71 = arith.constant 0.000000e+00 : f32
    %213 = vector.broadcast %cst_71 : f32 to vector<2x16xf32>
    %214 = arith.maximumf %212, %213 : vector<2x16xf32>
    %cst_72 = arith.constant dense<0xFF800000> : vector<2xf32>
    %215 = vector.multi_reduction <maximumf>, %214, %cst_72 [1] : vector<2x16xf32> to vector<2xf32>
    %216 = vector.shape_cast %215 : vector<2xf32> to vector<2x1xf32>
    %217 = vector.broadcast %216 : vector<2x1xf32> to vector<2x16xf32>
    %218 = arith.subf %214, %217 : vector<2x16xf32>
    %219 = math.exp %218 : vector<2x16xf32>
    %cst_73 = arith.constant dense<0.000000e+00> : vector<2xf32>
    %220 = vector.multi_reduction <add>, %219, %cst_73 [1] : vector<2x16xf32> to vector<2xf32>
    %221 = vector.shape_cast %220 : vector<2xf32> to vector<2x1xf32>
    %222 = math.log %221 : vector<2x1xf32>
    %223 = vector.broadcast %222 : vector<2x1xf32> to vector<2x16xf32>
    %224 = arith.subf %218, %223 : vector<2x16xf32>
    %c0_74 = arith.constant 0 : index
    %c0_75 = arith.constant 0 : index
    %225 = vector.load %arg15[%c0_74, %c0_75] : memref<2x16xf32, #tpu.memory_space<vmem>>, vector<2x16xf32>
    tpu.vector_store %arg15[%c0_74, %c0_75], %224 {strides = array<i32>} : memref<2x16xf32, #tpu.memory_space<vmem>>, vector<2x16xf32>,
    return
  }
}

</mosaic_0001>

<bundles_post_ra>
// kernel: seq_embed_time_forward.1
= control target key start
LH: loop header
LB: loop body
LE: loop exit
PB: predicated region body
PF: predicated region fallthrough
CT: control target
= control target key end

     0   :  { %s3994_s0 = inlined_call_operand.vmem [shape: f32[8,2,512], index: 0, kind: input, shape index: {}]   ;;  %s3995_s1 = inlined_call_operand.vmem [shape: f32[2,2], index: 1, kind: input, shape index: {}]   ;;  %s3996_s2 = inlined_call_operand.vmem [shape: f32[128,512], index: 2, kind: input, shape index: {}]   ;;  %s3997_s3 = inlined_call_operand.vmem [shape: f32[128,8], index: 3, kind: input, shape index: {}]   ;;  %s3998_s4 = inlined_call_operand.vmem [shape: f32[1,8], index: 4, kind: input, shape index: {}]   ;;  %s3999_s5 = inlined_call_operand.vmem [shape: f32[2,4], index: 5, kind: input, shape index: {}]   ;;  %s4000_s6 = inlined_call_operand.vmem [shape: f32[1,4], index: 6, kind: input, shape index: {}]   ;;  %s4001_s7 = inlined_call_operand.vmem [shape: f32[4,8], index: 7, kind: input, shape index: {}]   ;;  %s4002_s8 = inlined_call_operand.vmem [shape: f32[1,8], index: 8, kind: input, shape index: {}]   ;;  %s4003_s9 = inlined_call_operand.vmem [shape: f32[8,32], index: 9, kind: input, shape index: {}]   ;;  %s4004_s10 = inlined_call_operand.vmem [shape: f32[1,32], index: 10, kind: input, shape index: {}]   ;;  %s4005_s11 = inlined_call_operand.vmem [shape: f32[32,160], index: 11, kind: input, shape index: {}]   ;;  %s4006_s12 = inlined_call_operand.vmem [shape: f32[1,160], index: 12, kind: input, shape index: {}]   ;;  %s4007_s13 = inlined_call_operand.vmem [shape: f32[160,16], index: 13, kind: input, shape index: {}]   ;;  %s4008_s14 = inlined_call_operand.vmem [shape: f32[1,16], index: 14, kind: input, shape index: {}]   ;;  %s4009_s15 = inlined_call_operand.hbm [shape: f32[2,16], index: 15, kind: output, shape index: {}]  }
   0x1   :  { %v2534_v0 = vld [vmem:[%s3996_s2 + $0x1e8] sm:$0xff]  ;;  %v2539_v1 = vld [vmem:[%s3996_s2 + $0x1f8] sm:$0xff]  ;;  %v2544_v2 = vld [vmem:[%s3996_s2 + $0x1e0] sm:$0xff] }
   0x2   :  { %4072 = vst [vmem:[#allocation5_spill] sm:$0xff] %v2534_v0  ;;  %4073 = vst [vmem:[#allocation6_spill] sm:$0xff] %v2539_v1  ;;  %116 = vmatprep.subr.mxu0 %v2534_v0  ;;  %187 = vmatprep.subr.mxu1 %v2539_v1  ;;  %v2551_v3 = vld [vmem:[%s3996_s2 + $0x1f0] sm:$0xff]  ;;  %v2556_v4 = vld [vmem:[%s3996_s2 + $0x1c8] sm:$0xff] }
   0x3   :  { %v2561_v5 = vld [vmem:[%s3996_s2 + $0x1d8] sm:$0xff]  ;;  %117 = vmatpush1.msra.mxu0 %v2544_v2  ;;  %188 = vmatpush1.msra.mxu1 %v2551_v3  ;;  %v2568_v6 = vld [vmem:[%s3996_s2 + $0x1c0] sm:$0xff]  ;;  %v2573_v7 = vld [vmem:[%s3996_s2 + $0x1d0] sm:$0xff] }
   0x4   :  { %v2578_v8 = vld [vmem:[%s3996_s2 + $0x1a8] sm:$0xff]  ;;  %118 = vmatprep.subr.mxu0 %v2556_v4  ;;  %189 = vmatprep.subr.mxu1 %v2561_v5  ;;  %v2585_v9 = vld [vmem:[%s3996_s2 + $0x1b8] sm:$0xff]  ;;  %v2590_v10 = vld [vmem:[%s3996_s2 + $0x1a0] sm:$0xff] }
   0x5   :  { %v2595_v11 = vld [vmem:[%s3996_s2 + $0x1b0] sm:$0xff]  ;;  %119 = vmatpush1.msra.mxu0 %v2568_v6  ;;  %190 = vmatpush1.msra.mxu1 %v2573_v7  ;;  %v2602_v12 = vld [vmem:[%s3996_s2 + $0x188] sm:$0xff]  ;;  %v2607_v13 = vld [vmem:[%s3996_s2 + $0x198] sm:$0xff] }
   0x6   :  { %120 = vmatprep.subr.mxu0 %v2578_v8  ;;  %191 = vmatprep.subr.mxu1 %v2585_v9  ;;  %v2614_v14 = vld [vmem:[%s3996_s2 + $0x180] sm:$0xff]  ;;  %v2619_v15 = vld [vmem:[%s3996_s2 + $0x190] sm:$0xff]  ;;  %v2626_v16 = vld [vmem:[%s3996_s2 + $0x168] sm:$0xff] }
   0x7   :  { %121 = vmatpush1.msra.mxu0 %v2590_v10  ;;  %192 = vmatpush1.msra.mxu1 %v2595_v11  ;;  %v2631_v17 = vld [vmem:[%s3996_s2 + $0x178] sm:$0xff]  ;;  %v2638_v18 = vld [vmem:[%s3996_s2 + $0x160] sm:$0xff]  ;;  %v2643_v19 = vld [vmem:[%s3996_s2 + $0x170] sm:$0xff] }
   0x8   :  { %122 = vmatprep.subr.mxu0 %v2602_v12  ;;  %193 = vmatprep.subr.mxu1 %v2607_v13  ;;  %v2650_v20 = vld [vmem:[%s3996_s2 + $0x148] sm:$0xff]  ;;  %v2655_v21 = vld [vmem:[%s3996_s2 + $0x158] sm:$0xff]  ;;  %v2662_v22 = vld [vmem:[%s3996_s2 + $0x140] sm:$0xff] }
   0x9   :  { %123 = vmatpush1.msra.mxu0 %v2614_v14  ;;  %194 = vmatpush1.msra.mxu1 %v2619_v15  ;;  %v2667_v23 = vld [vmem:[%s3996_s2 + $0x150] sm:$0xff]  ;;  %v2674_v24 = vld [vmem:[%s3996_s2 + $0x128] sm:$0xff]  ;;  %v2679_v25 = vld [vmem:[%s3996_s2 + $0x138] sm:$0xff] }
   0xa   :  { %124 = vmatprep.subr.mxu0 %v2626_v16  ;;  %195 = vmatprep.subr.mxu1 %v2631_v17  ;;  %v2686_v26 = vld [vmem:[%s3996_s2 + $0x120] sm:$0xff]  ;;  %v2691_v27 = vld [vmem:[%s3996_s2 + $0x130] sm:$0xff]  ;;  %v2698_v28 = vld [vmem:[%s3996_s2 + $0x108] sm:$0xff] }
   0xb   :  { %125 = vmatpush1.msra.mxu0 %v2638_v18  ;;  %196 = vmatpush1.msra.mxu1 %v2643_v19  ;;  %v2703_v29 = vld [vmem:[%s3996_s2 + $0x118] sm:$0xff]  ;;  %v2710_v30 = vld [vmem:[%s3996_s2 + $0x100] sm:$0xff]  ;;  %v2715_v31 = vld [vmem:[%s3996_s2 + $0x110] sm:$0xff] }
   0xc   :  { %126 = vmatprep.subr.mxu0 %v2650_v20  ;;  %197 = vmatprep.subr.mxu1 %v2655_v21  ;;  %v2722_v32 = vld [vmem:[%s3996_s2 + $0xe8] sm:$0xff]  ;;  %v2727_v33 = vld [vmem:[%s3996_s2 + $0xf8] sm:$0xff]  ;;  %v2734_v34 = vld [vmem:[%s3996_s2 + $0xe0] sm:$0xff] }
   0xd   :  { %127 = vmatpush1.msra.mxu0 %v2662_v22  ;;  %198 = vmatpush1.msra.mxu1 %v2667_v23  ;;  %v2739_v35 = vld [vmem:[%s3996_s2 + $0xf0] sm:$0xff]  ;;  %v2746_v36 = vld [vmem:[%s3996_s2 + $0xc8] sm:$0xff]  ;;  %v2751_v37 = vld [vmem:[%s3996_s2 + $0xd8] sm:$0xff] }
   0xe   :  { %128 = vmatprep.subr.mxu0 %v2674_v24  ;;  %199 = vmatprep.subr.mxu1 %v2679_v25  ;;  %v2758_v38 = vld [vmem:[%s3996_s2 + $0xc0] sm:$0xff]  ;;  %v2763_v39 = vld [vmem:[%s3996_s2 + $0xd0] sm:$0xff]  ;;  %v2770_v40 = vld [vmem:[%s3996_s2 + $0xa8] sm:$0xff] }
   0xf   :  { %129 = vmatpush1.msra.mxu0 %v2686_v26  ;;  %200 = vmatpush1.msra.mxu1 %v2691_v27  ;;  %v2775_v41 = vld [vmem:[%s3996_s2 + $0xb8] sm:$0xff]  ;;  %v2782_v42 = vld [vmem:[%s3996_s2 + $0xa0] sm:$0xff]  ;;  %v2787_v43 = vld [vmem:[%s3996_s2 + $0xb0] sm:$0xff] }
  0x10   :  { %130 = vmatprep.subr.mxu0 %v2698_v28  ;;  %201 = vmatprep.subr.mxu1 %v2703_v29  ;;  %v2794_v44 = vld [vmem:[%s3996_s2 + $0x88] sm:$0xff]  ;;  %v2799_v45 = vld [vmem:[%s3996_s2 + $0x98] sm:$0xff]  ;;  %v2806_v46 = vld [vmem:[%s3996_s2 + $0x80] sm:$0xff] }
  0x11   :  { %131 = vmatpush1.msra.mxu0 %v2710_v30  ;;  %202 = vmatpush1.msra.mxu1 %v2715_v31  ;;  %v2811_v47 = vld [vmem:[%s3996_s2 + $0x90] sm:$0xff] }
  0x12   :  { %132 = vmatprep.subr.mxu0 %v2722_v32  ;;  %203 = vmatprep.subr.mxu1 %v2727_v33 }
  0x13   :  { %133 = vmatpush1.msra.mxu0 %v2734_v34  ;;  %204 = vmatpush1.msra.mxu1 %v2739_v35 }
  0x14   :  { %134 = vmatprep.subr.mxu0 %v2746_v36  ;;  %205 = vmatprep.subr.mxu1 %v2751_v37 }
  0x15   :  { %135 = vmatpush1.msra.mxu0 %v2758_v38  ;;  %206 = vmatpush1.msra.mxu1 %v2763_v39 }
  0x16   :  { %136 = vmatprep.subr.mxu0 %v2770_v40  ;;  %207 = vmatprep.subr.mxu1 %v2775_v41 }
  0x17   :  { %20 = vsyncpa [#allocation3], 0  ;;  %137 = vmatpush1.msra.mxu0 %v2782_v42  ;;  %208 = vmatpush1.msra.mxu1 %v2787_v43  ;;  %v2818_v48 = vld [vmem:[%s3996_s2 + $0x68] sm:$0xff]  ;;  %v2823_v49 = vld [vmem:[%s3996_s2 + $0x78] sm:$0xff]  ;;  %vm2449_vm0 = vmmov 0   ;;  %vm1717_vm1 = vcmask 1041408  }
  0x18   :  { %4074 = vst [vmem:[#allocation7_spill] sm:$0xff] %v2818_v48  ;;  %4075 = vst [vmem:[#allocation8_spill] sm:$0xff] %v2823_v49  ;;  %138 = vmatprep.subr.mxu0 %v2794_v44  ;;  %209 = vmatprep.subr.mxu1 %v2799_v45  ;;  %v2830_v50 = vld [vmem:[%s3996_s2 + $0x60] sm:$0xff]  ;;  %v2835_v51 = vld [vmem:[%s3996_s2 + $0x70] sm:$0xff]  ;;  %vm1713_vm2 = vcmask 15360   ;;  %vm1804_vm3 = vcmask 1043456  }
  0x19   :  { %4076 = vst [vmem:[#allocation9_spill] sm:$0xff] %v2830_v50  ;;  %4077 = vst [vmem:[#allocation10_spill] sm:$0xff] %v2835_v51  ;;  %139 = vmatpush1.msra.mxu0 %v2806_v46  ;;  %210 = vmatpush1.msra.mxu1 %v2811_v47  ;;  %v2842_v52 = vld [vmem:[%s3996_s2 + $0x48] sm:$0xff]  ;;  %v2847_v53 = vld [vmem:[%s3996_s2 + $0x58] sm:$0xff]  ;;  %vm1800_vm4 = vcmask 31744   ;;  %vm1888_vm5 = vcmask 64512  }
  0x1a   :  { %4078 = vst [vmem:[#allocation11_spill] sm:$0xff] %v2842_v52  ;;  %4079 = vst [vmem:[#allocation12_spill] sm:$0xff] %v2847_v53  ;;  %140 = vmatprep.subr.mxu0 %v2818_v48  ;;  %211 = vmatprep.subr.mxu1 %v2823_v49  ;;  %v2854_v54 = vld [vmem:[%s3996_s2 + $0x40] sm:$0xff]  ;;  %v2859_v55 = vld [vmem:[%s3996_s2 + $0x50] sm:$0xff]  ;;  %vm1983_vm6 = vcmask 261120   ;;  %vm2161_vm7 = vcmask 123904  }
  0x1b   :  { %4080 = vst [vmem:[#allocation13_spill] sm:$0xff] %v2854_v54  ;;  %4081 = vst [vmem:[#allocation14_spill] sm:$0xff] %v2859_v55  ;;  %141 = vmatpush1.msra.mxu0 %v2830_v50  ;;  %212 = vmatpush1.msra.mxu1 %v2835_v51  ;;  %v2866_v56 = vld [vmem:[%s3996_s2 + $0x28] sm:$0xff]  ;;  %v2871_v57 = vld [vmem:[%s3996_s2 + $0x38] sm:$0xff] }
  0x1c   :  { %4082 = vst [vmem:[#allocation15_spill] sm:$0xff] %v2866_v56  ;;  %4083 = vst [vmem:[#allocation16_spill] sm:$0xff] %v2871_v57  ;;  %142 = vmatprep.subr.mxu0 %v2842_v52  ;;  %213 = vmatprep.subr.mxu1 %v2847_v53  ;;  %v2878_v58 = vld [vmem:[%s3996_s2 + $0x20] sm:$0xff]  ;;  %v2883_v59 = vld [vmem:[%s3996_s2 + $0x30] sm:$0xff] }
  0x1d   :  { %4084 = vst [vmem:[#allocation17_spill] sm:$0xff] %v2878_v58  ;;  %4085 = vst [vmem:[#allocation18_spill] sm:$0xff] %v2883_v59  ;;  %143 = vmatpush1.msra.mxu0 %v2854_v54  ;;  %214 = vmatpush1.msra.mxu1 %v2859_v55  ;;  %v2890_v60 = vld [vmem:[%s3996_s2 + $0x8] sm:$0xff]  ;;  %v2895_v61 = vld [vmem:[%s3996_s2 + $0x18] sm:$0xff] }
  0x1e   :  { %4086 = vst [vmem:[#allocation19_spill] sm:$0xff] %v2890_v60  ;;  %4087 = vst [vmem:[#allocation20_spill] sm:$0xff] %v2895_v61  ;;  %144 = vmatprep.subr.mxu0 %v2866_v56  ;;  %215 = vmatprep.subr.mxu1 %v2871_v57  ;;  %v2902_v62 = vld [vmem:[%s3996_s2] sm:$0xff]  ;;  %v2909_v63 = vld [vmem:[%s3996_s2 + $0x10] sm:$0xff]  ;;  %v4012_v57 = vmov 0.0  }
  0x1f   :  { %4088 = vst [vmem:[#allocation21_spill] sm:$0xff] %v2902_v62  ;;  %145 = vmatpush1.msra.mxu0 %v2878_v58  ;;  %216 = vmatpush1.msra.mxu1 %v2883_v59  ;;  %4089 = vst [vmem:[#allocation22_spill] sm:$0xff] %v2909_v63 }
  0x20   :  { %146 = vmatprep.subr.mxu0 %v2890_v60  ;;  %217 = vmatprep.subr.mxu1 %v2895_v61 }
  0x21   :  { %147 = vmatpush1.msra.mxu0 %v2902_v62  ;;  %180 = vmatprep.mubr.f32.mxu0 %v4012_v57 }
  0x22   :  { %218 = vmatpush1.msra.mxu1 %v2909_v63  ;;  %251 = vmatprep.mubr.f32.mxu1 %v4012_v57 }
  0x23   :  { %181 = vmatmul.mubr.f32.vlgmr.msra.gmra.mxu0 %v4012_v57  ;;  %252 = vmatmul.mubr.f32.vlgmr.msra.gmra.mxu1 %v4012_v57  ;;  %v4090_v57 = vld [vmem:[#allocation16_spill] sm:$0xff] }
  0x24   :  { %303 = vmatprep.subr.mxu0 %v2534_v0  ;;  %374 = vmatprep.subr.mxu1 %v2539_v1 }
  0x25   :  { %304 = vmatpush1.msra.mxu0 %v2544_v2  ;;  %375 = vmatpush1.msra.mxu1 %v2551_v3 }
  0x26   :  { %305 = vmatprep.subr.mxu0 %v2556_v4  ;;  %376 = vmatprep.subr.mxu1 %v2561_v5 }
  0x27   :  { %306 = vmatpush1.msra.mxu0 %v2568_v6  ;;  %377 = vmatpush1.msra.mxu1 %v2573_v7 }
  0x28   :  { %307 = vmatprep.subr.mxu0 %v2578_v8  ;;  %378 = vmatprep.subr.mxu1 %v2585_v9 }
  0x29   :  { %308 = vmatpush1.msra.mxu0 %v2590_v10  ;;  %379 = vmatpush1.msra.mxu1 %v2595_v11 }
  0x2a   :  { %309 = vmatprep.subr.mxu0 %v2602_v12  ;;  %380 = vmatprep.subr.mxu1 %v2607_v13 }
  0x2b   :  { %310 = vmatpush1.msra.mxu0 %v2614_v14  ;;  %381 = vmatpush1.msra.mxu1 %v2619_v15 }
  0x2c   :  { %311 = vmatprep.subr.mxu0 %v2626_v16  ;;  %382 = vmatprep.subr.mxu1 %v2631_v17 }
  0x2d   :  { %312 = vmatpush1.msra.mxu0 %v2638_v18  ;;  %383 = vmatpush1.msra.mxu1 %v2643_v19 }
  0x2e   :  { %313 = vmatprep.subr.mxu0 %v2650_v20  ;;  %384 = vmatprep.subr.mxu1 %v2655_v21 }
  0x2f   :  { %314 = vmatpush1.msra.mxu0 %v2662_v22  ;;  %385 = vmatpush1.msra.mxu1 %v2667_v23 }
  0x30   :  { %315 = vmatprep.subr.mxu0 %v2674_v24  ;;  %386 = vmatprep.subr.mxu1 %v2679_v25 }
  0x31   :  { %316 = vmatpush1.msra.mxu0 %v2686_v26  ;;  %387 = vmatpush1.msra.mxu1 %v2691_v27 }
  0x32   :  { %317 = vmatprep.subr.mxu0 %v2698_v28  ;;  %388 = vmatprep.subr.mxu1 %v2703_v29 }
  0x33   :  { %318 = vmatpush1.msra.mxu0 %v2710_v30  ;;  %389 = vmatpush1.msra.mxu1 %v2715_v31 }
  0x34   :  { %319 = vmatprep.subr.mxu0 %v2722_v32  ;;  %390 = vmatprep.subr.mxu1 %v2727_v33 }
  0x35   :  { %320 = vmatpush1.msra.mxu0 %v2734_v34  ;;  %391 = vmatpush1.msra.mxu1 %v2739_v35 }
  0x36   :  { %321 = vmatprep.subr.mxu0 %v2746_v36  ;;  %392 = vmatprep.subr.mxu1 %v2751_v37 }
  0x37   :  { %322 = vmatpush1.msra.mxu0 %v2758_v38  ;;  %393 = vmatpush1.msra.mxu1 %v2763_v39 }
  0x38   :  { %323 = vmatprep.subr.mxu0 %v2770_v40  ;;  %394 = vmatprep.subr.mxu1 %v2775_v41 }
  0x39   :  { %324 = vmatpush1.msra.mxu0 %v2782_v42  ;;  %395 = vmatpush1.msra.mxu1 %v2787_v43 }
  0x3a   :  { %325 = vmatprep.subr.mxu0 %v2794_v44  ;;  %396 = vmatprep.subr.mxu1 %v2799_v45 }
  0x3b   :  { %326 = vmatpush1.msra.mxu0 %v2806_v46  ;;  %397 = vmatpush1.msra.mxu1 %v2811_v47 }
  0x3c   :  { %327 = vmatprep.subr.mxu0 %v2818_v48  ;;  %398 = vmatprep.subr.mxu1 %v2823_v49 }
  0x3d   :  { %328 = vmatpush1.msra.mxu0 %v2830_v50  ;;  %399 = vmatpush1.msra.mxu1 %v2835_v51 }
  0x3e   :  { %329 = vmatprep.subr.mxu0 %v2842_v52  ;;  %400 = vmatprep.subr.mxu1 %v2847_v53  ;;  %v4091_v52 = vmov 0.0  }
  0x3f   :  { %330 = vmatpush1.msra.mxu0 %v2854_v54  ;;  %401 = vmatpush1.msra.mxu1 %v2859_v55 }
  0x40   :  { %331 = vmatprep.subr.mxu0 %v2866_v56  ;;  %402 = vmatprep.subr.mxu1 %v4090_v57  ;;  %v2448_v57 = vmov 1983009808   ;;  %v267_v56 = vlaneseq }
  0x41   :  { %332 = vmatpush1.msra.mxu0 %v2878_v58  ;;  %403 = vmatpush1.msra.mxu1 %v2883_v59  ;;  %v265_v58 = vunpack.c.l.s4 %v2448_v57  ;;  %v115_v57 = vld [vmem:[%s3994_s0] sm:$0xff] }
  0x42   :  { %333 = vmatprep.subr.mxu0 %v2890_v60  ;;  %404 = vmatprep.subr.mxu1 %v2895_v61  ;;  %v2987_v55 = vshrl.u32 %v267_v56, 7 }
  0x43   :  { %334 = vmatpush1.msra.mxu0 %v2902_v62  ;;  %367 = vmatprep.mubr.f32.mxu0 %v4091_v52  ;;  %v266_v59 = vunpack.c.0.s8 %v265_v58 }
  0x44   :  { %405 = vmatpush1.msra.mxu1 %v2909_v63  ;;  %438 = vmatprep.mubr.f32.mxu1 %v4091_v52  ;;  %4092 = vst [vmem:[#allocation23_spill] sm:$0xff] %v2987_v55 }
  0x45   :  { %490 = vmatprep.subr.mxu0 %v2534_v0  ;;  %561 = vmatprep.subr.mxu1 %v2539_v1  ;;  %v2990_v62 = vsub.s32 %v266_v59, %v2987_v55 }
  0x47   :  { %4093 = vst [vmem:[#allocation24_spill] sm:$0xff] %v2990_v62 }
  0xe3   :  { %v182_v60 = vpop.f32.mrf.mxu0  ;;  %v253_v61 = vpop.f32.mrf.mxu1 }
  0xe5   :  { %v184_v54 = vpop.f32.mrf.mxu0  ;;  %v255_v53 = vpop.f32.mrf.mxu1 }
  0xe6   :  { %v262_v63 = vcombine.low %v182_v60, %v184_v54  ;;  %v263_v51 = vcombine.low %v253_v61, %v255_v53 }
  0xe8   :  { %v270_v52 = vrot.slane %v262_v63, %v2990_v62  ;;  %v277_v0 = vrot.slane %v263_v51, %v2990_v62 }
  0xea   :  { %v278_v58 = vcombine.low %v270_v52, %v277_v0  ;;  %v4097_v52 = vld [vmem:[#allocation11_spill] sm:$0xff] }
  0xec   :  { %v280_v56 = vadd.f32 %v278_v58, %v115_v57  ;;  %v4100_v57 = vld [vmem:[#allocation14_spill] sm:$0xff]  ;;  %v4101_v58 = vld [vmem:[#allocation15_spill] sm:$0xff] }
  0xee   :  { %v2189_v1 = vmul.f32 -1.442695, %v280_v56  ;;  %v288_v59 = vrot.slane %v280_v56, 6  ;;  %v4102_v56 = vld [vmem:[#allocation16_spill] sm:$0xff] }
  0xf0   :  { %2293 = vpow2.f32 %v2189_v1  ;;  %v4094_v1 = vld [vmem:[#allocation8_spill] sm:$0xff] }
  0xfd   :  { %v2294_v50 = vpop.eup %2293 }
  0xfe   :  { %v284_v49 = vadd.f32 1.0, %v2294_v50  ;;  %v4096_v50 = vld [vmem:[#allocation10_spill] sm:$0xff] }
 0x100   :  { %2295 = vrcp.f32 %v284_v49  ;;  %v4095_v49 = vld [vmem:[#allocation9_spill] sm:$0xff] }
 0x101   :  { %2297 = vtanh.f32 %v288_v59  ;;  %v4103_v59 = vld [vmem:[#allocation17_spill] sm:$0xff] }
 0x10d   :  { %v2296_v55 = vpop.eup %2295 }
 0x10e   :  { %v292_v54 = vrot.slane %v2296_v55, 2  ;;  %v2298_v53 = vpop.eup %2297  ;;  %v298_v51 = vrot.slane %v2296_v55, 4 }
 0x10f   :  { %v295_v60 = vmul.f32 %v2298_v53, %v2296_v55  ;;  %v4098_v55 = vld [vmem:[#allocation12_spill] sm:$0xff]  ;;  %v4105_v53 = vld [vmem:[#allocation19_spill] sm:$0xff] }
 0x110   :  { %v294_v61 = vmul.f32 0.0, %v292_v54  ;;  %v4104_v54 = vld [vmem:[#allocation18_spill] sm:$0xff] }
 0x112   :  { %v2997_v63 = vadd.f32 %v295_v60, %v294_v61  ;;  %v4106_v60 = vld [vmem:[#allocation20_spill] sm:$0xff]  ;;  %v4107_v61 = vld [vmem:[#allocation21_spill] sm:$0xff] }
 0x114   :  { %2299 = vtanh.f32 %v2997_v63 }
 0x121   :  { %v2300_v62 = vpop.eup %2299 }
 0x122   :  { %v300_v0 = vmul.f32 %v2300_v62, %v298_v51  ;;  %v4099_v62 = vld [vmem:[#allocation13_spill] sm:$0xff]  ;;  %v4108_v51 = vmov 0.0  }
 0x124   :  { %368 = vmatmul.mubr.f32.vlgmr.msra.gmra.mxu0 %v300_v0  ;;  %439 = vmatmul.mubr.f32.vlgmr.msra.gmra.mxu1 %v300_v0  ;;  %v4109_v0 = vld [vmem:[#allocation22_spill] sm:$0xff] }
 0x125   :  { %491 = vmatpush1.msra.mxu0 %v2544_v2  ;;  %562 = vmatpush1.msra.mxu1 %v2551_v3 }
 0x126   :  { %492 = vmatprep.subr.mxu0 %v2556_v4  ;;  %563 = vmatprep.subr.mxu1 %v2561_v5 }
 0x127   :  { %493 = vmatpush1.msra.mxu0 %v2568_v6  ;;  %564 = vmatpush1.msra.mxu1 %v2573_v7 }
 0x128   :  { %494 = vmatprep.subr.mxu0 %v2578_v8  ;;  %565 = vmatprep.subr.mxu1 %v2585_v9 }
 0x129   :  { %495 = vmatpush1.msra.mxu0 %v2590_v10  ;;  %566 = vmatpush1.msra.mxu1 %v2595_v11 }
 0x12a   :  { %496 = vmatprep.subr.mxu0 %v2602_v12  ;;  %567 = vmatprep.subr.mxu1 %v2607_v13 }
 0x12b   :  { %497 = vmatpush1.msra.mxu0 %v2614_v14  ;;  %568 = vmatpush1.msra.mxu1 %v2619_v15 }
 0x12c   :  { %498 = vmatprep.subr.mxu0 %v2626_v16  ;;  %569 = vmatprep.subr.mxu1 %v2631_v17 }
 0x12d   :  { %499 = vmatpush1.msra.mxu0 %v2638_v18  ;;  %570 = vmatpush1.msra.mxu1 %v2643_v19 }
 0x12e   :  { %500 = vmatprep.subr.mxu0 %v2650_v20  ;;  %571 = vmatprep.subr.mxu1 %v2655_v21 }
 0x12f   :  { %501 = vmatpush1.msra.mxu0 %v2662_v22  ;;  %572 = vmatpush1.msra.mxu1 %v2667_v23 }
 0x130   :  { %502 = vmatprep.subr.mxu0 %v2674_v24  ;;  %573 = vmatprep.subr.mxu1 %v2679_v25 }
 0x131   :  { %503 = vmatpush1.msra.mxu0 %v2686_v26  ;;  %574 = vmatpush1.msra.mxu1 %v2691_v27 }
 0x132   :  { %504 = vmatprep.subr.mxu0 %v2698_v28  ;;  %575 = vmatprep.subr.mxu1 %v2703_v29 }
 0x133   :  { %505 = vmatpush1.msra.mxu0 %v2710_v30  ;;  %576 = vmatpush1.msra.mxu1 %v2715_v31 }
 0x134   :  { %506 = vmatprep.subr.mxu0 %v2722_v32  ;;  %577 = vmatprep.subr.mxu1 %v2727_v33 }
 0x135   :  { %507 = vmatpush1.msra.mxu0 %v2734_v34  ;;  %578 = vmatpush1.msra.mxu1 %v2739_v35 }
 0x136   :  { %508 = vmatprep.subr.mxu0 %v2746_v36  ;;  %579 = vmatprep.subr.mxu1 %v2751_v37 }
 0x137   :  { %509 = vmatpush1.msra.mxu0 %v2758_v38  ;;  %580 = vmatpush1.msra.mxu1 %v2763_v39 }
 0x138   :  { %510 = vmatprep.subr.mxu0 %v2770_v40  ;;  %581 = vmatprep.subr.mxu1 %v2775_v41 }
 0x139   :  { %511 = vmatpush1.msra.mxu0 %v2782_v42  ;;  %582 = vmatpush1.msra.mxu1 %v2787_v43 }
 0x13a   :  { %512 = vmatprep.subr.mxu0 %v2794_v44  ;;  %583 = vmatprep.subr.mxu1 %v2799_v45 }
 0x13b   :  { %513 = vmatpush1.msra.mxu0 %v2806_v46  ;;  %584 = vmatpush1.msra.mxu1 %v2811_v47 }
 0x13c   :  { %514 = vmatprep.subr.mxu0 %v2818_v48  ;;  %585 = vmatprep.subr.mxu1 %v4094_v1 }
 0x13d   :  { %515 = vmatpush1.msra.mxu0 %v4095_v49  ;;  %586 = vmatpush1.msra.mxu1 %v4096_v50 }
 0x13e   :  { %516 = vmatprep.subr.mxu0 %v4097_v52  ;;  %587 = vmatprep.subr.mxu1 %v4098_v55  ;;  %v4112_v52 = vld [vmem:[#allocation24_spill] sm:$0xff] }
 0x13f   :  { %517 = vmatpush1.msra.mxu0 %v4099_v62  ;;  %588 = vmatpush1.msra.mxu1 %v4100_v57  ;;  %v4110_v57 = vld [vmem:[#allocation5_spill] sm:$0xff] }
 0x140   :  { %518 = vmatprep.subr.mxu0 %v4101_v58  ;;  %589 = vmatprep.subr.mxu1 %v4102_v56  ;;  %v4111_v58 = vld [vmem:[#allocation6_spill] sm:$0xff] }
 0x141   :  { %519 = vmatpush1.msra.mxu0 %v4103_v59  ;;  %590 = vmatpush1.msra.mxu1 %v4104_v54 }
 0x142   :  { %520 = vmatprep.subr.mxu0 %v4105_v53  ;;  %591 = vmatprep.subr.mxu1 %v4106_v60 }
 0x143   :  { %521 = vmatpush1.msra.mxu0 %v4107_v61  ;;  %554 = vmatprep.mubr.f32.mxu0 %v4108_v51 }
 0x144   :  { %592 = vmatpush1.msra.mxu1 %v4109_v0  ;;  %625 = vmatprep.mubr.f32.mxu1 %v4108_v51  ;;  %v2190_v0 = vld [vmem:[%s3994_s0 + $0x8] sm:$0xff] }
 0x145   :  { %677 = vmatprep.subr.mxu0 %v4110_v57  ;;  %748 = vmatprep.subr.mxu1 %v4111_v58 }
 0x1e4   :  { %v369_v56 = vpop.f32.mrf.mxu0  ;;  %v440_v59 = vpop.f32.mrf.mxu1 }
 0x1e6   :  { %v371_v62 = vpop.f32.mrf.mxu0  ;;  %v442_v54 = vpop.f32.mrf.mxu1 }
 0x1e7   :  { %v449_v55 = vcombine.low %v369_v56, %v371_v62  ;;  %v450_v53 = vcombine.low %v440_v59, %v442_v54 }
 0x1e9   :  { %v457_v60 = vrot.slane %v449_v55, %v4112_v52  ;;  %v464_v61 = vrot.slane %v450_v53, %v4112_v52 }
 0x1eb   :  { %v465_v50 = vcombine.low %v457_v60, %v464_v61  ;;  %v4119_v61 = vld [vmem:[#allocation13_spill] sm:$0xff] }
 0x1ed   :  { %v467_v51 = vadd.f32 %v2190_v0, %v465_v50  ;;  %v4121_v0 = vld [vmem:[#allocation15_spill] sm:$0xff] }
 0x1ef   :  { %v2191_v49 = vmul.f32 -1.442695, %v467_v51  ;;  %v475_v1 = vrot.slane %v467_v51, 6  ;;  %v4120_v51 = vld [vmem:[#allocation14_spill] sm:$0xff] }
 0x1f1   :  { %2301 = vpow2.f32 %v2191_v49  ;;  %v4116_v49 = vld [vmem:[#allocation10_spill] sm:$0xff] }
 0x1fe   :  { %v2302_v57 = vpop.eup %2301 }
 0x1ff   :  { %v471_v58 = vadd.f32 1.0, %v2302_v57  ;;  %v4117_v57 = vld [vmem:[#allocation11_spill] sm:$0xff] }
 0x201   :  { %2303 = vrcp.f32 %v471_v58  ;;  %v4118_v58 = vld [vmem:[#allocation12_spill] sm:$0xff] }
 0x202   :  { %2305 = vtanh.f32 %v475_v1  ;;  %v4115_v1 = vld [vmem:[#allocation9_spill] sm:$0xff] }
 0x20e   :  { %v2304_v48 = vpop.eup %2303 }
 0x20f   :  { %v479_v62 = vrot.slane %v2304_v48, 2  ;;  %v2306_v56 = vpop.eup %2305  ;;  %v485_v53 = vrot.slane %v2304_v48, 4 }
 0x210   :  { %v482_v59 = vmul.f32 %v2306_v56, %v2304_v48  ;;  %v4113_v48 = vld [vmem:[#allocation7_spill] sm:$0xff]  ;;  %v4123_v56 = vld [vmem:[#allocation17_spill] sm:$0xff] }
 0x211   :  { %v481_v55 = vmul.f32 %v479_v62, %v2997_v63  ;;  %v4114_v63 = vld [vmem:[#allocation8_spill] sm:$0xff] }
 0x212   :  { %v4122_v62 = vld [vmem:[#allocation16_spill] sm:$0xff] }
 0x213   :  { %v3072_v54 = vadd.f32 %v482_v59, %v481_v55  ;;  %v4124_v59 = vld [vmem:[#allocation18_spill] sm:$0xff]  ;;  %v4125_v55 = vld [vmem:[#allocation19_spill] sm:$0xff] }
 0x215   :  { %2307 = vtanh.f32 %v3072_v54 }
 0x222   :  { %v2308_v60 = vpop.eup %2307 }
 0x223   :  { %v487_v50 = vmul.f32 %v2308_v60, %v485_v53  ;;  %v4126_v53 = vld [vmem:[#allocation20_spill] sm:$0xff]  ;;  %v4127_v60 = vld [vmem:[#allocation21_spill] sm:$0xff] }
 0x225   :  { %555 = vmatmul.mubr.f32.vlgmr.msra.gmra.mxu0 %v487_v50  ;;  %626 = vmatmul.mubr.f32.vlgmr.msra.gmra.mxu1 %v487_v50  ;;  %v4128_v50 = vmov 0.0  }
 0x226   :  { %678 = vmatpush1.msra.mxu0 %v2544_v2  ;;  %749 = vmatpush1.msra.mxu1 %v2551_v3 }
 0x227   :  { %679 = vmatprep.subr.mxu0 %v2556_v4  ;;  %750 = vmatprep.subr.mxu1 %v2561_v5 }
 0x228   :  { %680 = vmatpush1.msra.mxu0 %v2568_v6  ;;  %751 = vmatpush1.msra.mxu1 %v2573_v7 }
 0x229   :  { %681 = vmatprep.subr.mxu0 %v2578_v8  ;;  %752 = vmatprep.subr.mxu1 %v2585_v9 }
 0x22a   :  { %682 = vmatpush1.msra.mxu0 %v2590_v10  ;;  %753 = vmatpush1.msra.mxu1 %v2595_v11 }
 0x22b   :  { %683 = vmatprep.subr.mxu0 %v2602_v12  ;;  %754 = vmatprep.subr.mxu1 %v2607_v13 }
 0x22c   :  { %684 = vmatpush1.msra.mxu0 %v2614_v14  ;;  %755 = vmatpush1.msra.mxu1 %v2619_v15 }
 0x22d   :  { %685 = vmatprep.subr.mxu0 %v2626_v16  ;;  %756 = vmatprep.subr.mxu1 %v2631_v17 }
 0x22e   :  { %686 = vmatpush1.msra.mxu0 %v2638_v18  ;;  %757 = vmatpush1.msra.mxu1 %v2643_v19 }
 0x22f   :  { %687 = vmatprep.subr.mxu0 %v2650_v20  ;;  %758 = vmatprep.subr.mxu1 %v2655_v21 }
 0x230   :  { %688 = vmatpush1.msra.mxu0 %v2662_v22  ;;  %759 = vmatpush1.msra.mxu1 %v2667_v23 }
 0x231   :  { %689 = vmatprep.subr.mxu0 %v2674_v24  ;;  %760 = vmatprep.subr.mxu1 %v2679_v25 }
 0x232   :  { %690 = vmatpush1.msra.mxu0 %v2686_v26  ;;  %761 = vmatpush1.msra.mxu1 %v2691_v27 }
 0x233   :  { %691 = vmatprep.subr.mxu0 %v2698_v28  ;;  %762 = vmatprep.subr.mxu1 %v2703_v29 }
 0x234   :  { %692 = vmatpush1.msra.mxu0 %v2710_v30  ;;  %763 = vmatpush1.msra.mxu1 %v2715_v31 }
 0x235   :  { %693 = vmatprep.subr.mxu0 %v2722_v32  ;;  %764 = vmatprep.subr.mxu1 %v2727_v33 }
 0x236   :  { %694 = vmatpush1.msra.mxu0 %v2734_v34  ;;  %765 = vmatpush1.msra.mxu1 %v2739_v35 }
 0x237   :  { %695 = vmatprep.subr.mxu0 %v2746_v36  ;;  %766 = vmatprep.subr.mxu1 %v2751_v37 }
 0x238   :  { %696 = vmatpush1.msra.mxu0 %v2758_v38  ;;  %767 = vmatpush1.msra.mxu1 %v2763_v39 }
 0x239   :  { %697 = vmatprep.subr.mxu0 %v2770_v40  ;;  %768 = vmatprep.subr.mxu1 %v2775_v41 }
 0x23a   :  { %698 = vmatpush1.msra.mxu0 %v2782_v42  ;;  %769 = vmatpush1.msra.mxu1 %v2787_v43 }
 0x23b   :  { %699 = vmatprep.subr.mxu0 %v2794_v44  ;;  %770 = vmatprep.subr.mxu1 %v2799_v45 }
 0x23c   :  { %700 = vmatpush1.msra.mxu0 %v2806_v46  ;;  %771 = vmatpush1.msra.mxu1 %v2811_v47 }
 0x23d   :  { %701 = vmatprep.subr.mxu0 %v4113_v48  ;;  %772 = vmatprep.subr.mxu1 %v4114_v63 }
 0x23e   :  { %702 = vmatpush1.msra.mxu0 %v4115_v1  ;;  %773 = vmatpush1.msra.mxu1 %v4116_v49 }
 0x23f   :  { %703 = vmatprep.subr.mxu0 %v4117_v57  ;;  %774 = vmatprep.subr.mxu1 %v4118_v58  ;;  %v4129_v58 = vld [vmem:[#allocation22_spill] sm:$0xff] }
 0x240   :  { %704 = vmatpush1.msra.mxu0 %v4119_v61  ;;  %775 = vmatpush1.msra.mxu1 %v4120_v51  ;;  %v4130_v51 = vld [vmem:[#allocation5_spill] sm:$0xff] }
 0x241   :  { %705 = vmatprep.subr.mxu0 %v4121_v0  ;;  %776 = vmatprep.subr.mxu1 %v4122_v62  ;;  %v4131_v0 = vld [vmem:[#allocation6_spill] sm:$0xff] }
 0x242   :  { %706 = vmatpush1.msra.mxu0 %v4123_v56  ;;  %777 = vmatpush1.msra.mxu1 %v4124_v59 }
 0x243   :  { %707 = vmatprep.subr.mxu0 %v4125_v55  ;;  %778 = vmatprep.subr.mxu1 %v4126_v53 }
 0x244   :  { %708 = vmatpush1.msra.mxu0 %v4127_v60  ;;  %741 = vmatprep.mubr.f32.mxu0 %v4128_v50 }
 0x245   :  { %779 = vmatpush1.msra.mxu1 %v4129_v58  ;;  %812 = vmatprep.mubr.f32.mxu1 %v4128_v50  ;;  %v2192_v58 = vld [vmem:[%s3994_s0 + $0x10] sm:$0xff] }
 0x246   :  { %864 = vmatprep.subr.mxu0 %v4130_v51  ;;  %935 = vmatprep.subr.mxu1 %v4131_v0 }
 0x2e5   :  { %v556_v62 = vpop.f32.mrf.mxu0  ;;  %v627_v56 = vpop.f32.mrf.mxu1 }
 0x2e7   :  { %v558_v61 = vpop.f32.mrf.mxu0  ;;  %v629_v59 = vpop.f32.mrf.mxu1 }
 0x2e8   :  { %v636_v57 = vcombine.low %v556_v62, %v558_v61  ;;  %v637_v55 = vcombine.low %v627_v56, %v629_v59 }
 0x2ea   :  { %v644_v53 = vrot.slane %v636_v57, %v4112_v52  ;;  %v651_v60 = vrot.slane %v637_v55, %v4112_v52 }
 0x2ec   :  { %v652_v49 = vcombine.low %v644_v53, %v651_v60 }
 0x2ee   :  { %v654_v50 = vadd.f32 %v2192_v58, %v652_v49 }
 0x2f0   :  { %v2193_v1 = vmul.f32 -1.442695, %v654_v50  ;;  %v662_v63 = vrot.slane %v654_v50, 6 }
 0x2f2   :  { %2309 = vpow2.f32 %v2193_v1 }
 0x2ff   :  { %v2310_v51 = vpop.eup %2309 }
 0x300   :  { %v658_v0 = vadd.f32 1.0, %v2310_v51 }
 0x302   :  { %2311 = vrcp.f32 %v658_v0 }
 0x303   :  { %2313 = vtanh.f32 %v662_v63  ;;  %v4150_v63 = vld [vmem:[#allocation6_spill] sm:$0xff] }
 0x30f   :  { %v2312_v48 = vpop.eup %2311 }
 0x310   :  { %v666_v61 = vrot.slane %v2312_v48, 2  ;;  %v2314_v62 = vpop.eup %2313  ;;  %v672_v55 = vrot.slane %v2312_v48, 4 }
 0x311   :  { %v669_v56 = vmul.f32 %v2314_v62, %v2312_v48  ;;  %v4149_v48 = vld [vmem:[#allocation5_spill] sm:$0xff] }
 0x312   :  { %v668_v57 = vmul.f32 %v666_v61, %v3072_v54  ;;  %v4148_v54 = vld [vmem:[#allocation22_spill] sm:$0xff] }
 0x314   :  { %v3147_v59 = vadd.f32 %v669_v56, %v668_v57  ;;  %v2194_v56 = vld [vmem:[%s3994_s0 + $0x18] sm:$0xff] }
 0x316   :  { %2315 = vtanh.f32 %v3147_v59 }
 0x323   :  { %v2316_v53 = vpop.eup %2315 }
 0x324   :  { %v674_v49 = vmul.f32 %v2316_v53, %v672_v55 }
 0x326   :  { %742 = vmatmul.mubr.f32.vlgmr.msra.gmra.mxu0 %v674_v49  ;;  %813 = vmatmul.mubr.f32.vlgmr.msra.gmra.mxu1 %v674_v49 }
 0x327   :  { %865 = vmatpush1.msra.mxu0 %v2544_v2  ;;  %936 = vmatpush1.msra.mxu1 %v2551_v3  ;;  %v4132_v2 = vld [vmem:[#allocation7_spill] sm:$0xff]  ;;  %v4133_v3 = vld [vmem:[#allocation8_spill] sm:$0xff] }
 0x328   :  { %866 = vmatprep.subr.mxu0 %v2556_v4  ;;  %937 = vmatprep.subr.mxu1 %v2561_v5  ;;  %v4134_v4 = vld [vmem:[#allocation9_spill] sm:$0xff]  ;;  %v4135_v5 = vld [vmem:[#allocation10_spill] sm:$0xff] }
 0x329   :  { %867 = vmatpush1.msra.mxu0 %v2568_v6  ;;  %938 = vmatpush1.msra.mxu1 %v2573_v7  ;;  %v4136_v6 = vld [vmem:[#allocation11_spill] sm:$0xff]  ;;  %v4137_v7 = vld [vmem:[#allocation12_spill] sm:$0xff] }
 0x32a   :  { %868 = vmatprep.subr.mxu0 %v2578_v8  ;;  %939 = vmatprep.subr.mxu1 %v2585_v9  ;;  %v4138_v8 = vld [vmem:[#allocation13_spill] sm:$0xff]  ;;  %v4139_v9 = vld [vmem:[#allocation14_spill] sm:$0xff] }
 0x32b   :  { %869 = vmatpush1.msra.mxu0 %v2590_v10  ;;  %940 = vmatpush1.msra.mxu1 %v2595_v11  ;;  %v4140_v10 = vld [vmem:[#allocation15_spill] sm:$0xff]  ;;  %v4141_v11 = vld [vmem:[#allocation16_spill] sm:$0xff] }
 0x32c   :  { %870 = vmatprep.subr.mxu0 %v2602_v12  ;;  %941 = vmatprep.subr.mxu1 %v2607_v13  ;;  %v4142_v12 = vld [vmem:[#allocation17_spill] sm:$0xff]  ;;  %v4143_v13 = vld [vmem:[#allocation18_spill] sm:$0xff] }
 0x32d   :  { %871 = vmatpush1.msra.mxu0 %v2614_v14  ;;  %942 = vmatpush1.msra.mxu1 %v2619_v15  ;;  %v4144_v14 = vld [vmem:[#allocation19_spill] sm:$0xff]  ;;  %v4145_v15 = vld [vmem:[#allocation20_spill] sm:$0xff] }
 0x32e   :  { %872 = vmatprep.subr.mxu0 %v2626_v16  ;;  %943 = vmatprep.subr.mxu1 %v2631_v17  ;;  %v4146_v16 = vld [vmem:[#allocation21_spill] sm:$0xff]  ;;  %v4147_v17 = vmov 0.0  }
 0x32f   :  { %873 = vmatpush1.msra.mxu0 %v2638_v18  ;;  %944 = vmatpush1.msra.mxu1 %v2643_v19 }
 0x330   :  { %874 = vmatprep.subr.mxu0 %v2650_v20  ;;  %945 = vmatprep.subr.mxu1 %v2655_v21 }
 0x331   :  { %875 = vmatpush1.msra.mxu0 %v2662_v22  ;;  %946 = vmatpush1.msra.mxu1 %v2667_v23 }
 0x332   :  { %876 = vmatprep.subr.mxu0 %v2674_v24  ;;  %947 = vmatprep.subr.mxu1 %v2679_v25 }
 0x333   :  { %877 = vmatpush1.msra.mxu0 %v2686_v26  ;;  %948 = vmatpush1.msra.mxu1 %v2691_v27 }
 0x334   :  { %878 = vmatprep.subr.mxu0 %v2698_v28  ;;  %949 = vmatprep.subr.mxu1 %v2703_v29 }
 0x335   :  { %879 = vmatpush1.msra.mxu0 %v2710_v30  ;;  %950 = vmatpush1.msra.mxu1 %v2715_v31 }
 0x336   :  { %880 = vmatprep.subr.mxu0 %v2722_v32  ;;  %951 = vmatprep.subr.mxu1 %v2727_v33 }
 0x337   :  { %881 = vmatpush1.msra.mxu0 %v2734_v34  ;;  %952 = vmatpush1.msra.mxu1 %v2739_v35 }
 0x338   :  { %882 = vmatprep.subr.mxu0 %v2746_v36  ;;  %953 = vmatprep.subr.mxu1 %v2751_v37 }
 0x339   :  { %883 = vmatpush1.msra.mxu0 %v2758_v38  ;;  %954 = vmatpush1.msra.mxu1 %v2763_v39 }
 0x33a   :  { %884 = vmatprep.subr.mxu0 %v2770_v40  ;;  %955 = vmatprep.subr.mxu1 %v2775_v41 }
 0x33b   :  { %885 = vmatpush1.msra.mxu0 %v2782_v42  ;;  %956 = vmatpush1.msra.mxu1 %v2787_v43 }
 0x33c   :  { %886 = vmatprep.subr.mxu0 %v2794_v44  ;;  %957 = vmatprep.subr.mxu1 %v2799_v45 }
 0x33d   :  { %887 = vmatpush1.msra.mxu0 %v2806_v46  ;;  %958 = vmatpush1.msra.mxu1 %v2811_v47 }
 0x33e   :  { %888 = vmatprep.subr.mxu0 %v4132_v2  ;;  %959 = vmatprep.subr.mxu1 %v4133_v3 }
 0x33f   :  { %889 = vmatpush1.msra.mxu0 %v4134_v4  ;;  %960 = vmatpush1.msra.mxu1 %v4135_v5 }
 0x340   :  { %890 = vmatprep.subr.mxu0 %v4136_v6  ;;  %961 = vmatprep.subr.mxu1 %v4137_v7 }
 0x341   :  { %891 = vmatpush1.msra.mxu0 %v4138_v8  ;;  %962 = vmatpush1.msra.mxu1 %v4139_v9 }
 0x342   :  { %892 = vmatprep.subr.mxu0 %v4140_v10  ;;  %963 = vmatprep.subr.mxu1 %v4141_v11 }
 0x343   :  { %893 = vmatpush1.msra.mxu0 %v4142_v12  ;;  %964 = vmatpush1.msra.mxu1 %v4143_v13 }
 0x344   :  { %894 = vmatprep.subr.mxu0 %v4144_v14  ;;  %965 = vmatprep.subr.mxu1 %v4145_v15 }
 0x345   :  { %895 = vmatpush1.msra.mxu0 %v4146_v16  ;;  %928 = vmatprep.mubr.f32.mxu0 %v4147_v17 }
 0x346   :  { %966 = vmatpush1.msra.mxu1 %v4148_v54  ;;  %999 = vmatprep.mubr.f32.mxu1 %v4147_v17 }
 0x347   :  { %1051 = vmatprep.subr.mxu0 %v4149_v48  ;;  %1122 = vmatprep.subr.mxu1 %v4150_v63 }
 0x3e6   :  { %v743_v1 = vpop.f32.mrf.mxu0  ;;  %v814_v58 = vpop.f32.mrf.mxu1 }
 0x3e8   :  { %v745_v51 = vpop.f32.mrf.mxu0  ;;  %v816_v0 = vpop.f32.mrf.mxu1 }
 0x3e9   :  { %v823_v60 = vcombine.low %v743_v1, %v745_v51  ;;  %v824_v50 = vcombine.low %v814_v58, %v816_v0 }
 0x3eb   :  { %v831_v61 = vrot.slane %v823_v60, %v4112_v52  ;;  %v838_v62 = vrot.slane %v824_v50, %v4112_v52 }
 0x3ed   :  { %v839_v57 = vcombine.low %v831_v61, %v838_v62 }
 0x3ef   :  { %v841_v55 = vadd.f32 %v2194_v56, %v839_v57  ;;  %v3228_v56 = vld [vmem:[%s3996_s2 + $0x1e0] sm:$0xff]  ;;  %v3246_v57 = vld [vmem:[%s3996_s2 + $0x1d8] sm:$0xff] }
 0x3f1   :  { %v2195_v53 = vmul.f32 -1.442695, %v841_v55  ;;  %v849_v63 = vrot.slane %v841_v55, 6  ;;  %v3252_v55 = vld [vmem:[%s3996_s2 + $0x1c0] sm:$0xff] }
 0x3f3   :  { %2317 = vpow2.f32 %v2195_v53  ;;  %v3258_v53 = vld [vmem:[%s3996_s2 + $0x1d0] sm:$0xff] }
 0x400   :  { %v2318_v49 = vpop.eup %2317 }
 0x401   :  { %v845_v48 = vadd.f32 1.0, %v2318_v49  ;;  %v3264_v49 = vld [vmem:[%s3996_s2 + $0x1a8] sm:$0xff] }
 0x403   :  { %2319 = vrcp.f32 %v845_v48  ;;  %v3270_v48 = vld [vmem:[%s3996_s2 + $0x1b8] sm:$0xff] }
 0x404   :  { %2321 = vtanh.f32 %v849_v63  ;;  %v3276_v63 = vld [vmem:[%s3996_s2 + $0x1a0] sm:$0xff] }
 0x410   :  { %v2320_v54 = vpop.eup %2319 }
 0x411   :  { %v853_v1 = vrot.slane %v2320_v54, 2  ;;  %v2322_v58 = vpop.eup %2321  ;;  %v859_v50 = vrot.slane %v2320_v54, 4 }
 0x412   :  { %v856_v51 = vmul.f32 %v2322_v58, %v2320_v54  ;;  %v3240_v54 = vld [vmem:[%s3996_s2 + $0x1c8] sm:$0xff] }
 0x413   :  { %v855_v0 = vmul.f32 %v853_v1, %v3147_v59  ;;  %v3234_v59 = vld [vmem:[%s3996_s2 + $0x1f0] sm:$0xff]  ;;  %v3288_v58 = vld [vmem:[%s3996_s2 + $0x188] sm:$0xff] }
 0x414   :  { %v3282_v1 = vld [vmem:[%s3996_s2 + $0x1b0] sm:$0xff] }
 0x415   :  { %v3222_v60 = vadd.f32 %v856_v51, %v855_v0  ;;  %v3294_v51 = vld [vmem:[%s3996_s2 + $0x198] sm:$0xff]  ;;  %v3300_v0 = vld [vmem:[%s3996_s2 + $0x180] sm:$0xff] }
 0x417   :  { %2323 = vtanh.f32 %v3222_v60 }
 0x424   :  { %v2324_v61 = vpop.eup %2323 }
 0x425   :  { %v861_v62 = vmul.f32 %v2324_v61, %v859_v50  ;;  %v3306_v50 = vld [vmem:[%s3996_s2 + $0x190] sm:$0xff]  ;;  %v3312_v61 = vld [vmem:[%s3996_s2 + $0x168] sm:$0xff] }
 0x427   :  { %929 = vmatmul.mubr.f32.vlgmr.msra.gmra.mxu0 %v861_v62  ;;  %1000 = vmatmul.mubr.f32.vlgmr.msra.gmra.mxu1 %v861_v62  ;;  %v3318_v62 = vld [vmem:[%s3996_s2 + $0x178] sm:$0xff] }
 0x428   :  { %1052 = vmatpush1.msra.mxu0 %v3228_v56  ;;  %1123 = vmatpush1.msra.mxu1 %v3234_v59 }
 0x429   :  { %1053 = vmatprep.subr.mxu0 %v3240_v54  ;;  %1124 = vmatprep.subr.mxu1 %v3246_v57 }
 0x42a   :  { %1054 = vmatpush1.msra.mxu0 %v3252_v55  ;;  %1125 = vmatpush1.msra.mxu1 %v3258_v53 }
 0x42b   :  { %1055 = vmatprep.subr.mxu0 %v3264_v49  ;;  %1126 = vmatprep.subr.mxu1 %v3270_v48 }
 0x42c   :  { %1056 = vmatpush1.msra.mxu0 %v3276_v63  ;;  %1127 = vmatpush1.msra.mxu1 %v3282_v1 }
 0x42d   :  { %1057 = vmatprep.subr.mxu0 %v3288_v58  ;;  %1128 = vmatprep.subr.mxu1 %v3294_v51 }
 0x42e   :  { %1058 = vmatpush1.msra.mxu0 %v3300_v0  ;;  %1129 = vmatpush1.msra.mxu1 %v3306_v50 }
 0x42f   :  { %1059 = vmatprep.subr.mxu0 %v3312_v61  ;;  %1130 = vmatprep.subr.mxu1 %v3318_v62 }
 0x430   :  { %1060 = vmatpush1.msra.mxu0 %v2638_v18  ;;  %1131 = vmatpush1.msra.mxu1 %v2643_v19  ;;  %v4151_v18 = vld [vmem:[#allocation22_spill] sm:$0xff] }
 0x431   :  { %1061 = vmatprep.subr.mxu0 %v2650_v20  ;;  %1132 = vmatprep.subr.mxu1 %v2655_v21  ;;  %v3372_v19 = vld [vmem:[%s3996_s2 + $0x1e8] sm:$0xff]  ;;  %v3378_v20 = vld [vmem:[%s3996_s2 + $0x1f8] sm:$0xff] }
 0x432   :  { %1062 = vmatpush1.msra.mxu0 %v2662_v22  ;;  %1133 = vmatpush1.msra.mxu1 %v2667_v23 }
 0x433   :  { %1063 = vmatprep.subr.mxu0 %v2674_v24  ;;  %1134 = vmatprep.subr.mxu1 %v2679_v25 }
 0x434   :  { %1064 = vmatpush1.msra.mxu0 %v2686_v26  ;;  %1135 = vmatpush1.msra.mxu1 %v2691_v27 }
 0x435   :  { %1065 = vmatprep.subr.mxu0 %v2698_v28  ;;  %1136 = vmatprep.subr.mxu1 %v2703_v29  ;;  %v2196_v29 = vld [vmem:[%s3994_s0 + $0x20] sm:$0xff] }
 0x436   :  { %1066 = vmatpush1.msra.mxu0 %v2710_v30  ;;  %1137 = vmatpush1.msra.mxu1 %v2715_v31 }
 0x437   :  { %1067 = vmatprep.subr.mxu0 %v2722_v32  ;;  %1138 = vmatprep.subr.mxu1 %v2727_v33 }
 0x438   :  { %1068 = vmatpush1.msra.mxu0 %v2734_v34  ;;  %1139 = vmatpush1.msra.mxu1 %v2739_v35 }
 0x439   :  { %1069 = vmatprep.subr.mxu0 %v2746_v36  ;;  %1140 = vmatprep.subr.mxu1 %v2751_v37 }
 0x43a   :  { %1070 = vmatpush1.msra.mxu0 %v2758_v38  ;;  %1141 = vmatpush1.msra.mxu1 %v2763_v39 }
 0x43b   :  { %1071 = vmatprep.subr.mxu0 %v2770_v40  ;;  %1142 = vmatprep.subr.mxu1 %v2775_v41 }
 0x43c   :  { %1072 = vmatpush1.msra.mxu0 %v2782_v42  ;;  %1143 = vmatpush1.msra.mxu1 %v2787_v43 }
 0x43d   :  { %1073 = vmatprep.subr.mxu0 %v2794_v44  ;;  %1144 = vmatprep.subr.mxu1 %v2799_v45  ;;  %v3409_v45 = vld [vmem:[%s3996_s2 + $0x160] sm:$0xff] }
 0x43e   :  { %1074 = vmatpush1.msra.mxu0 %v2806_v46  ;;  %1145 = vmatpush1.msra.mxu1 %v2811_v47  ;;  %v3415_v46 = vld [vmem:[%s3996_s2 + $0x170] sm:$0xff]  ;;  %v3421_v47 = vld [vmem:[%s3996_s2 + $0x148] sm:$0xff] }
 0x43f   :  { %1075 = vmatprep.subr.mxu0 %v4132_v2  ;;  %1146 = vmatprep.subr.mxu1 %v4133_v3  ;;  %v3427_v2 = vld [vmem:[%s3996_s2 + $0x158] sm:$0xff]  ;;  %v3433_v3 = vld [vmem:[%s3996_s2 + $0x140] sm:$0xff] }
 0x440   :  { %1076 = vmatpush1.msra.mxu0 %v4134_v4  ;;  %1147 = vmatpush1.msra.mxu1 %v4135_v5  ;;  %v3439_v4 = vld [vmem:[%s3996_s2 + $0x150] sm:$0xff]  ;;  %v3445_v5 = vld [vmem:[%s3996_s2 + $0x128] sm:$0xff] }
 0x441   :  { %1077 = vmatprep.subr.mxu0 %v4136_v6  ;;  %1148 = vmatprep.subr.mxu1 %v4137_v7  ;;  %v3451_v6 = vld [vmem:[%s3996_s2 + $0x138] sm:$0xff]  ;;  %v3457_v7 = vld [vmem:[%s3996_s2 + $0x120] sm:$0xff] }
 0x442   :  { %1078 = vmatpush1.msra.mxu0 %v4138_v8  ;;  %1149 = vmatpush1.msra.mxu1 %v4139_v9  ;;  %v3463_v8 = vld [vmem:[%s3996_s2 + $0x130] sm:$0xff]  ;;  %v3469_v9 = vld [vmem:[%s3996_s2 + $0x108] sm:$0xff] }
 0x443   :  { %1079 = vmatprep.subr.mxu0 %v4140_v10  ;;  %1150 = vmatprep.subr.mxu1 %v4141_v11  ;;  %v3475_v10 = vld [vmem:[%s3996_s2 + $0x118] sm:$0xff]  ;;  %v3481_v11 = vld [vmem:[%s3996_s2 + $0x100] sm:$0xff] }
 0x444   :  { %1080 = vmatpush1.msra.mxu0 %v4142_v12  ;;  %1151 = vmatpush1.msra.mxu1 %v4143_v13  ;;  %v3487_v12 = vld [vmem:[%s3996_s2 + $0x110] sm:$0xff]  ;;  %v3493_v13 = vld [vmem:[%s3996_s2 + $0xe8] sm:$0xff] }
 0x445   :  { %1081 = vmatprep.subr.mxu0 %v4144_v14  ;;  %1152 = vmatprep.subr.mxu1 %v4145_v15  ;;  %v3499_v14 = vld [vmem:[%s3996_s2 + $0xf8] sm:$0xff]  ;;  %v3505_v15 = vld [vmem:[%s3996_s2 + $0xe0] sm:$0xff] }
 0x446   :  { %1082 = vmatpush1.msra.mxu0 %v4146_v16  ;;  %1115 = vmatprep.mubr.f32.mxu0 %v4147_v17  ;;  %v3511_v16 = vld [vmem:[%s3996_s2 + $0xf0] sm:$0xff] }
 0x447   :  { %1153 = vmatpush1.msra.mxu1 %v4151_v18  ;;  %1186 = vmatprep.mubr.f32.mxu1 %v4147_v17  ;;  %v3523_v18 = vld [vmem:[%s3996_s2 + $0xd8] sm:$0xff] }
 0x448   :  { %1238 = vmatprep.subr.mxu0 %v3372_v19  ;;  %1309 = vmatprep.subr.mxu1 %v3378_v20 }
 0x4e7   :  { %v930_v21 = vpop.f32.mrf.mxu0  ;;  %v1001_v22 = vpop.f32.mrf.mxu1 }
 0x4e9   :  { %v932_v23 = vpop.f32.mrf.mxu0  ;;  %v1003_v24 = vpop.f32.mrf.mxu1 }
 0x4ea   :  { %v1010_v25 = vcombine.low %v930_v21, %v932_v23  ;;  %v1011_v26 = vcombine.low %v1001_v22, %v1003_v24  ;;  %v3529_v21 = vld [vmem:[%s3996_s2 + $0xc0] sm:$0xff]  ;;  %v3535_v22 = vld [vmem:[%s3996_s2 + $0xd0] sm:$0xff]  ;;  %v3541_v23 = vld [vmem:[%s3996_s2 + $0xa8] sm:$0xff] }
 0x4eb   :  { %v3547_v24 = vld [vmem:[%s3996_s2 + $0xb8] sm:$0xff] }
 0x4ec   :  { %v1018_v27 = vrot.slane %v1010_v25, %v4112_v52  ;;  %v1025_v28 = vrot.slane %v1011_v26, %v4112_v52  ;;  %v3553_v25 = vld [vmem:[%s3996_s2 + $0xa0] sm:$0xff]  ;;  %v3559_v26 = vld [vmem:[%s3996_s2 + $0xb0] sm:$0xff] }
 0x4ee   :  { %v1026_v30 = vcombine.low %v1018_v27, %v1025_v28  ;;  %v3565_v27 = vld [vmem:[%s3996_s2 + $0x88] sm:$0xff]  ;;  %v3571_v28 = vld [vmem:[%s3996_s2 + $0x98] sm:$0xff] }
 0x4f0   :  { %v1028_v31 = vadd.f32 %v2196_v29, %v1026_v30  ;;  %v3577_v29 = vld [vmem:[%s3996_s2 + $0x80] sm:$0xff]  ;;  %v3583_v30 = vld [vmem:[%s3996_s2 + $0x90] sm:$0xff] }
 0x4f2   :  { %v2197_v32 = vmul.f32 -1.442695, %v1028_v31  ;;  %v1036_v35 = vrot.slane %v1028_v31, 6  ;;  %v3589_v31 = vld [vmem:[%s3996_s2 + $0x68] sm:$0xff] }
 0x4f3   :  { %4152 = vst [vmem:[#allocation24_spill] sm:$0xff] %v3589_v31 }
 0x4f4   :  { %2325 = vpow2.f32 %v2197_v32  ;;  %v3595_v32 = vld [vmem:[%s3996_s2 + $0x78] sm:$0xff] }
 0x4f5   :  { %4153 = vst [vmem:[#allocation7_spill] sm:$0xff] %v3595_v32 }
 0x501   :  { %v2326_v33 = vpop.eup %2325 }
 0x502   :  { %v1032_v34 = vadd.f32 1.0, %v2326_v33  ;;  %v3601_v33 = vld [vmem:[%s3996_s2 + $0x60] sm:$0xff] }
 0x503   :  { %4154 = vst [vmem:[#allocation8_spill] sm:$0xff] %v3601_v33 }
 0x504   :  { %2327 = vrcp.f32 %v1032_v34  ;;  %v3607_v34 = vld [vmem:[%s3996_s2 + $0x70] sm:$0xff] }
 0x505   :  { %2329 = vtanh.f32 %v1036_v35  ;;  %4155 = vst [vmem:[#allocation9_spill] sm:$0xff] %v3607_v34  ;;  %v3613_v35 = vld [vmem:[%s3996_s2 + $0x48] sm:$0xff] }
 0x506   :  { %4156 = vst [vmem:[#allocation10_spill] sm:$0xff] %v3613_v35 }
 0x511   :  { %v2328_v36 = vpop.eup %2327 }
 0x512   :  { %v1040_v37 = vrot.slane %v2328_v36, 2  ;;  %v2330_v38 = vpop.eup %2329  ;;  %v1046_v42 = vrot.slane %v2328_v36, 4 }
 0x513   :  { %v1043_v39 = vmul.f32 %v2330_v38, %v2328_v36  ;;  %v3619_v36 = vld [vmem:[%s3996_s2 + $0x58] sm:$0xff]  ;;  %v3631_v38 = vld [vmem:[%s3996_s2 + $0x50] sm:$0xff] }
 0x514   :  { %v1042_v40 = vmul.f32 %v1040_v37, %v3222_v60  ;;  %v3517_v60 = vld [vmem:[%s3996_s2 + $0xc8] sm:$0xff]  ;;  %4157 = vst [vmem:[#allocation11_spill] sm:$0xff] %v3619_v36  ;;  %v3625_v37 = vld [vmem:[%s3996_s2 + $0x40] sm:$0xff]  ;;  %4159 = vst [vmem:[#allocation13_spill] sm:$0xff] %v3631_v38 }
 0x515   :  { %4158 = vst [vmem:[#allocation12_spill] sm:$0xff] %v3625_v37 }
 0x516   :  { %v3387_v41 = vadd.f32 %v1043_v39, %v1042_v40  ;;  %v3637_v39 = vld [vmem:[%s3996_s2 + $0x28] sm:$0xff]  ;;  %v3643_v40 = vld [vmem:[%s3996_s2 + $0x38] sm:$0xff] }
 0x517   :  { %4160 = vst [vmem:[#allocation14_spill] sm:$0xff] %v3637_v39  ;;  %4161 = vst [vmem:[#allocation15_spill] sm:$0xff] %v3643_v40 }
 0x518   :  { %2331 = vtanh.f32 %v3387_v41 }
 0x525   :  { %v2332_v43 = vpop.eup %2331 }
 0x526   :  { %v1048_v44 = vmul.f32 %v2332_v43, %v1046_v42  ;;  %v3649_v42 = vld [vmem:[%s3996_s2 + $0x20] sm:$0xff]  ;;  %v3655_v43 = vld [vmem:[%s3996_s2 + $0x30] sm:$0xff] }
 0x527   :  { %4162 = vst [vmem:[#allocation16_spill] sm:$0xff] %v3649_v42  ;;  %4163 = vst [vmem:[#allocation17_spill] sm:$0xff] %v3655_v43 }
 0x528   :  { %1116 = vmatmul.mubr.f32.vlgmr.msra.gmra.mxu0 %v1048_v44  ;;  %1187 = vmatmul.mubr.f32.vlgmr.msra.gmra.mxu1 %v1048_v44  ;;  %v3661_v44 = vld [vmem:[%s3996_s2 + $0x8] sm:$0xff] }
 0x529   :  { %1239 = vmatpush1.msra.mxu0 %v3228_v56  ;;  %1310 = vmatpush1.msra.mxu1 %v3234_v59  ;;  %4164 = vst [vmem:[#allocation18_spill] sm:$0xff] %v3661_v44 }
 0x52a   :  { %1240 = vmatprep.subr.mxu0 %v3240_v54  ;;  %1311 = vmatprep.subr.mxu1 %v3246_v57 }
 0x52b   :  { %1241 = vmatpush1.msra.mxu0 %v3252_v55  ;;  %1312 = vmatpush1.msra.mxu1 %v3258_v53 }
 0x52c   :  { %1242 = vmatprep.subr.mxu0 %v3264_v49  ;;  %1313 = vmatprep.subr.mxu1 %v3270_v48 }
 0x52d   :  { %1243 = vmatpush1.msra.mxu0 %v3276_v63  ;;  %1314 = vmatpush1.msra.mxu1 %v3282_v1 }
 0x52e   :  { %1244 = vmatprep.subr.mxu0 %v3288_v58  ;;  %1315 = vmatprep.subr.mxu1 %v3294_v51 }
 0x52f   :  { %1245 = vmatpush1.msra.mxu0 %v3300_v0  ;;  %1316 = vmatpush1.msra.mxu1 %v3306_v50 }
 0x530   :  { %1246 = vmatprep.subr.mxu0 %v3312_v61  ;;  %1317 = vmatprep.subr.mxu1 %v3318_v62 }
 0x531   :  { %1247 = vmatpush1.msra.mxu0 %v3409_v45  ;;  %1318 = vmatpush1.msra.mxu1 %v3415_v46 }
 0x532   :  { %1248 = vmatprep.subr.mxu0 %v3421_v47  ;;  %1319 = vmatprep.subr.mxu1 %v3427_v2 }
 0x533   :  { %1249 = vmatpush1.msra.mxu0 %v3433_v3  ;;  %1320 = vmatpush1.msra.mxu1 %v3439_v4 }
 0x534   :  { %1250 = vmatprep.subr.mxu0 %v3445_v5  ;;  %1321 = vmatprep.subr.mxu1 %v3451_v6 }
 0x535   :  { %1251 = vmatpush1.msra.mxu0 %v3457_v7  ;;  %1322 = vmatpush1.msra.mxu1 %v3463_v8 }
 0x536   :  { %1252 = vmatprep.subr.mxu0 %v3469_v9  ;;  %1323 = vmatprep.subr.mxu1 %v3475_v10 }
 0x537   :  { %1253 = vmatpush1.msra.mxu0 %v3481_v11  ;;  %1324 = vmatpush1.msra.mxu1 %v3487_v12 }
 0x538   :  { %1254 = vmatprep.subr.mxu0 %v3493_v13  ;;  %1325 = vmatprep.subr.mxu1 %v3499_v14 }
 0x539   :  { %1255 = vmatpush1.msra.mxu0 %v3505_v15  ;;  %1326 = vmatpush1.msra.mxu1 %v3511_v16 }
 0x53a   :  { %1256 = vmatprep.subr.mxu0 %v3517_v60  ;;  %1327 = vmatprep.subr.mxu1 %v3523_v18 }
 0x53b   :  { %1257 = vmatpush1.msra.mxu0 %v3529_v21  ;;  %1328 = vmatpush1.msra.mxu1 %v3535_v22 }
 0x53c   :  { %1258 = vmatprep.subr.mxu0 %v3541_v23  ;;  %1329 = vmatprep.subr.mxu1 %v3547_v24 }
 0x53d   :  { %1259 = vmatpush1.msra.mxu0 %v3553_v25  ;;  %1330 = vmatpush1.msra.mxu1 %v3559_v26 }
 0x53e   :  { %1260 = vmatprep.subr.mxu0 %v3565_v27  ;;  %1331 = vmatprep.subr.mxu1 %v3571_v28 }
 0x53f   :  { %1261 = vmatpush1.msra.mxu0 %v3577_v29  ;;  %1332 = vmatpush1.msra.mxu1 %v3583_v30 }
 0x540   :  { %1262 = vmatprep.subr.mxu0 %v3589_v31  ;;  %1333 = vmatprep.subr.mxu1 %v3595_v32 }
 0x541   :  { %1263 = vmatpush1.msra.mxu0 %v3601_v33  ;;  %1334 = vmatpush1.msra.mxu1 %v3607_v34 }
 0x542   :  { %1264 = vmatprep.subr.mxu0 %v3613_v35  ;;  %1335 = vmatprep.subr.mxu1 %v3619_v36 }
 0x543   :  { %1265 = vmatpush1.msra.mxu0 %v3625_v37  ;;  %1336 = vmatpush1.msra.mxu1 %v3631_v38 }
 0x544   :  { %1266 = vmatprep.subr.mxu0 %v3637_v39  ;;  %1337 = vmatprep.subr.mxu1 %v3643_v40  ;;  %v3667_v40 = vld [vmem:[%s3996_s2 + $0x18] sm:$0xff] }
 0x545   :  { %1267 = vmatpush1.msra.mxu0 %v3649_v42  ;;  %1338 = vmatpush1.msra.mxu1 %v3655_v43  ;;  %4165 = vst [vmem:[#allocation19_spill] sm:$0xff] %v3667_v40  ;;  %v3673_v42 = vld [vmem:[%s3996_s2] sm:$0xff] }
 0x546   :  { %1268 = vmatprep.subr.mxu0 %v3661_v44  ;;  %1339 = vmatprep.subr.mxu1 %v3667_v40  ;;  %4166 = vst [vmem:[#allocation20_spill] sm:$0xff] %v3673_v42  ;;  %v3680_v44 = vld [vmem:[%s3996_s2 + $0x10] sm:$0xff] }
 0x547   :  { %1269 = vmatpush1.msra.mxu0 %v3673_v42  ;;  %1302 = vmatprep.mubr.f32.mxu0 %v4147_v17  ;;  %4167 = vst [vmem:[#allocation21_spill] sm:$0xff] %v3680_v44 }
 0x548   :  { %1340 = vmatpush1.msra.mxu1 %v3680_v44  ;;  %1373 = vmatprep.mubr.f32.mxu1 %v4147_v17  ;;  %v2198_v44 = vld [vmem:[%s3994_s0 + $0x28] sm:$0xff] }
 0x549   :  { %1425 = vmatprep.subr.mxu0 %v3372_v19  ;;  %1496 = vmatprep.subr.mxu1 %v3378_v20 }
 0x5e8   :  { %v1117_v40 = vpop.f32.mrf.mxu0  ;;  %v1188_v43 = vpop.f32.mrf.mxu1 }
 0x5ea   :  { %v1119_v39 = vpop.f32.mrf.mxu0  ;;  %v1190_v38 = vpop.f32.mrf.mxu1 }
 0x5eb   :  { %v1197_v42 = vcombine.low %v1117_v40, %v1119_v39  ;;  %v1198_v37 = vcombine.low %v1188_v43, %v1190_v38 }
 0x5ed   :  { %v1205_v36 = vrot.slane %v1197_v42, %v4112_v52  ;;  %v1212_v35 = vrot.slane %v1198_v37, %v4112_v52 }
 0x5ef   :  { %v1213_v34 = vcombine.low %v1205_v36, %v1212_v35  ;;  %v1615_v36 = vld [vmem:[%s3997_s3 + $0x28] sm:$0xff] }
 0x5f1   :  { %v1215_v17 = vadd.f32 %v2198_v44, %v1213_v34  ;;  %v1614_v44 = vld [vmem:[%s3997_s3 + $0x20] sm:$0xff] }
 0x5f3   :  { %v2199_v33 = vmul.f32 -1.442695, %v1215_v17  ;;  %v1223_v32 = vrot.slane %v1215_v17, 6  ;;  %v4168_v17 = vld [vmem:[#allocation24_spill] sm:$0xff] }
 0x5f5   :  { %2333 = vpow2.f32 %v2199_v33  ;;  %v1616_v33 = vld [vmem:[%s3997_s3 + $0x30] sm:$0xff] }
 0x602   :  { %v2334_v19 = vpop.eup %2333 }
 0x603   :  { %v1219_v20 = vadd.f32 1.0, %v2334_v19  ;;  %v1613_v19 = vld [vmem:[%s3997_s3 + $0x18] sm:$0xff] }
 0x605   :  { %2335 = vrcp.f32 %v1219_v20  ;;  %v1612_v20 = vld [vmem:[%s3997_s3 + $0x10] sm:$0xff] }
 0x606   :  { %2337 = vtanh.f32 %v1223_v32  ;;  %v1617_v32 = vld [vmem:[%s3997_s3 + $0x38] sm:$0xff] }
 0x612   :  { %v2336_v31 = vpop.eup %2335 }
 0x613   :  { %v1227_v39 = vrot.slane %v2336_v31, 2  ;;  %v2338_v38 = vpop.eup %2337  ;;  %v1233_v43 = vrot.slane %v2336_v31, 4 }
 0x614   :  { %v1230_v40 = vmul.f32 %v2338_v38, %v2336_v31  ;;  %v1618_v31 = vld [vmem:[%s3997_s3 + $0x40] sm:$0xff] }
 0x615   :  { %v1229_v42 = vmul.f32 %v1227_v39, %v3387_v41  ;;  %v1611_v39 = vld [vmem:[%s3997_s3 + $0x8] sm:$0xff]  ;;  %v1610_v38 = vld [vmem:[%s3997_s3] sm:$0xff] }
 0x617   :  { %v3692_v37 = vadd.f32 %v1230_v40, %v1229_v42 }
 0x619   :  { %2339 = vtanh.f32 %v3692_v37 }
 0x626   :  { %v2340_v35 = vpop.eup %2339 }
 0x627   :  { %v1235_v34 = vmul.f32 %v2340_v35, %v1233_v43 }
 0x629   :  { %1303 = vmatmul.mubr.f32.vlgmr.msra.gmra.mxu0 %v1235_v34  ;;  %1374 = vmatmul.mubr.f32.vlgmr.msra.gmra.mxu1 %v1235_v34 }
 0x62a   :  { %1426 = vmatpush1.msra.mxu0 %v3228_v56  ;;  %1497 = vmatpush1.msra.mxu1 %v3234_v59  ;;  %v4169_v56 = vld [vmem:[#allocation7_spill] sm:$0xff]  ;;  %v4170_v59 = vld [vmem:[#allocation8_spill] sm:$0xff] }
 0x62b   :  { %1427 = vmatprep.subr.mxu0 %v3240_v54  ;;  %1498 = vmatprep.subr.mxu1 %v3246_v57  ;;  %v4171_v54 = vld [vmem:[#allocation9_spill] sm:$0xff]  ;;  %v4172_v57 = vld [vmem:[#allocation10_spill] sm:$0xff] }
 0x62c   :  { %1428 = vmatpush1.msra.mxu0 %v3252_v55  ;;  %1499 = vmatpush1.msra.mxu1 %v3258_v53  ;;  %v4173_v55 = vld [vmem:[#allocation11_spill] sm:$0xff]  ;;  %v4174_v53 = vld [vmem:[#allocation12_spill] sm:$0xff] }
 0x62d   :  { %1429 = vmatprep.subr.mxu0 %v3264_v49  ;;  %1500 = vmatprep.subr.mxu1 %v3270_v48  ;;  %v4175_v49 = vld [vmem:[#allocation13_spill] sm:$0xff]  ;;  %v4176_v48 = vld [vmem:[#allocation14_spill] sm:$0xff] }
 0x62e   :  { %1430 = vmatpush1.msra.mxu0 %v3276_v63  ;;  %1501 = vmatpush1.msra.mxu1 %v3282_v1  ;;  %v4177_v63 = vld [vmem:[#allocation15_spill] sm:$0xff]  ;;  %v4178_v1 = vld [vmem:[#allocation16_spill] sm:$0xff] }
 0x62f   :  { %1431 = vmatprep.subr.mxu0 %v3288_v58  ;;  %1502 = vmatprep.subr.mxu1 %v3294_v51  ;;  %v4179_v58 = vld [vmem:[#allocation17_spill] sm:$0xff]  ;;  %v4180_v51 = vld [vmem:[#allocation18_spill] sm:$0xff] }
 0x630   :  { %1432 = vmatpush1.msra.mxu0 %v3300_v0  ;;  %1503 = vmatpush1.msra.mxu1 %v3306_v50  ;;  %v4181_v0 = vld [vmem:[#allocation19_spill] sm:$0xff]  ;;  %v4182_v50 = vld [vmem:[#allocation20_spill] sm:$0xff] }
 0x631   :  { %1433 = vmatprep.subr.mxu0 %v3312_v61  ;;  %1504 = vmatprep.subr.mxu1 %v3318_v62  ;;  %v4183_v61 = vmov 0.0   ;;  %v4184_v62 = vld [vmem:[#allocation21_spill] sm:$0xff] }
 0x632   :  { %1434 = vmatpush1.msra.mxu0 %v3409_v45  ;;  %1505 = vmatpush1.msra.mxu1 %v3415_v46 }
 0x633   :  { %1435 = vmatprep.subr.mxu0 %v3421_v47  ;;  %1506 = vmatprep.subr.mxu1 %v3427_v2 }
 0x634   :  { %1436 = vmatpush1.msra.mxu0 %v3433_v3  ;;  %1507 = vmatpush1.msra.mxu1 %v3439_v4 }
 0x635   :  { %1437 = vmatprep.subr.mxu0 %v3445_v5  ;;  %1508 = vmatprep.subr.mxu1 %v3451_v6  ;;  %v2200_v6 = vld [vmem:[%s3994_s0 + $0x30] sm:$0xff] }
 0x636   :  { %1438 = vmatpush1.msra.mxu0 %v3457_v7  ;;  %1509 = vmatpush1.msra.mxu1 %v3463_v8 }
 0x637   :  { %1439 = vmatprep.subr.mxu0 %v3469_v9  ;;  %1510 = vmatprep.subr.mxu1 %v3475_v10 }
 0x638   :  { %1440 = vmatpush1.msra.mxu0 %v3481_v11  ;;  %1511 = vmatpush1.msra.mxu1 %v3487_v12 }
 0x639   :  { %1441 = vmatprep.subr.mxu0 %v3493_v13  ;;  %1512 = vmatprep.subr.mxu1 %v3499_v14 }
 0x63a   :  { %1442 = vmatpush1.msra.mxu0 %v3505_v15  ;;  %1513 = vmatpush1.msra.mxu1 %v3511_v16 }
 0x63b   :  { %1443 = vmatprep.subr.mxu0 %v3517_v60  ;;  %1514 = vmatprep.subr.mxu1 %v3523_v18 }
 0x63c   :  { %1444 = vmatpush1.msra.mxu0 %v3529_v21  ;;  %1515 = vmatpush1.msra.mxu1 %v3535_v22 }
 0x63d   :  { %1445 = vmatprep.subr.mxu0 %v3541_v23  ;;  %1516 = vmatprep.subr.mxu1 %v3547_v24  ;;  %v1625_v24 = vld [vmem:[%s3997_s3 + $0x78] sm:$0xff] }
 0x63e   :  { %1446 = vmatpush1.msra.mxu0 %v3553_v25  ;;  %1517 = vmatpush1.msra.mxu1 %v3559_v26  ;;  %v1624_v25 = vld [vmem:[%s3997_s3 + $0x70] sm:$0xff]  ;;  %v1623_v26 = vld [vmem:[%s3997_s3 + $0x68] sm:$0xff] }
 0x63f   :  { %1447 = vmatprep.subr.mxu0 %v3565_v27  ;;  %1518 = vmatprep.subr.mxu1 %v3571_v28  ;;  %v1622_v27 = vld [vmem:[%s3997_s3 + $0x60] sm:$0xff]  ;;  %v1621_v28 = vld [vmem:[%s3997_s3 + $0x58] sm:$0xff] }
 0x640   :  { %1448 = vmatpush1.msra.mxu0 %v3577_v29  ;;  %1519 = vmatpush1.msra.mxu1 %v3583_v30  ;;  %v1620_v29 = vld [vmem:[%s3997_s3 + $0x50] sm:$0xff]  ;;  %v1619_v30 = vld [vmem:[%s3997_s3 + $0x48] sm:$0xff] }
 0x641   :  { %1449 = vmatprep.subr.mxu0 %v4168_v17  ;;  %1520 = vmatprep.subr.mxu1 %v4169_v56 }
 0x642   :  { %1450 = vmatpush1.msra.mxu0 %v4170_v59  ;;  %1521 = vmatpush1.msra.mxu1 %v4171_v54  ;;  %v2202_v59 = vld [vmem:[%s3994_s0 + $0x38] sm:$0xff] }
 0x643   :  { %1451 = vmatprep.subr.mxu0 %v4172_v57  ;;  %1522 = vmatprep.subr.mxu1 %v4173_v55 }
 0x644   :  { %1452 = vmatpush1.msra.mxu0 %v4174_v53  ;;  %1523 = vmatpush1.msra.mxu1 %v4175_v49 }
 0x645   :  { %1453 = vmatprep.subr.mxu0 %v4176_v48  ;;  %1524 = vmatprep.subr.mxu1 %v4177_v63 }
 0x646   :  { %1454 = vmatpush1.msra.mxu0 %v4178_v1  ;;  %1525 = vmatpush1.msra.mxu1 %v4179_v58 }
 0x647   :  { %1455 = vmatprep.subr.mxu0 %v4180_v51  ;;  %1526 = vmatprep.subr.mxu1 %v4181_v0 }
 0x648   :  { %1456 = vmatpush1.msra.mxu0 %v4182_v50  ;;  %1489 = vmatprep.mubr.f32.mxu0 %v4183_v61 }
 0x649   :  { %1527 = vmatpush1.msra.mxu1 %v4184_v62  ;;  %1560 = vmatprep.mubr.f32.mxu1 %v4183_v61 }
 0x64a   :  { %2239 = vmatprep.subr.mxu0 %v4183_v61  ;;  %2279 = vmatprep.subr.mxu1 %v4183_v61 }
 0x6e9   :  { %v1304_v41 = vpop.f32.mrf.mxu0  ;;  %v1375_v45 = vpop.f32.mrf.mxu1 }
 0x6eb   :  { %v1306_v46 = vpop.f32.mrf.mxu0  ;;  %v1377_v47 = vpop.f32.mrf.mxu1 }
 0x6ec   :  { %v1384_v2 = vcombine.low %v1304_v41, %v1306_v46  ;;  %v1385_v3 = vcombine.low %v1375_v45, %v1377_v47  ;;  %v1705_v45 = vld [vmem:[%s3999_s5] sm:$0x3] }
 0x6ed   :  { %v1704_v46 = vld [vmem:[%s3995_s1] sm:$0x3] }
 0x6ee   :  { %v1392_v4 = vrot.slane %v1384_v2, %v4112_v52  ;;  %v1399_v5 = vrot.slane %v1385_v3, %v4112_v52  ;;  %v1792_v47 = vld [vmem:[%s4001_s7] sm:$0xf] }
 0x6f0   :  { %v1400_v7 = vcombine.low %v1392_v4, %v1399_v5  ;;  %v2205_v4 = vld [vmem:[%s4000_s6] ss:$0 sm:$0xff] }
 0x6f2   :  { %v1402_v8 = vadd.f32 %v2200_v6, %v1400_v7 }
 0x6f4   :  { %v2201_v9 = vmul.f32 -1.442695, %v1402_v8  ;;  %v1410_v12 = vrot.slane %v1402_v8, 6 }
 0x6f6   :  { %2341 = vpow2.f32 %v2201_v9  ;;  %v1880_v9 = vld [vmem:[%s4003_s9] sm:$0xff] }
 0x703   :  { %v2342_v10 = vpop.eup %2341 }
 0x704   :  { %v1406_v11 = vadd.f32 1.0, %v2342_v10  ;;  %v1970_v10 = vld [vmem:[%s4005_s11 + $0x38] sm:$0xff] }
 0x706   :  { %2343 = vrcp.f32 %v1406_v11  ;;  %v1969_v11 = vld [vmem:[%s4005_s11 + $0x30] sm:$0xff] }
 0x707   :  { %2345 = vtanh.f32 %v1410_v12  ;;  %v1968_v12 = vld [vmem:[%s4005_s11 + $0x28] sm:$0xff] }
 0x713   :  { %v2344_v13 = vpop.eup %2343 }
 0x714   :  { %v1414_v14 = vrot.slane %v2344_v13, 2  ;;  %v2346_v15 = vpop.eup %2345  ;;  %v1420_v21 = vrot.slane %v2344_v13, 4 }
 0x715   :  { %v1417_v16 = vmul.f32 %v2346_v15, %v2344_v13  ;;  %v2204_v13 = vld [vmem:[%s3998_s4] ss:$0 sm:$0xff] }
 0x716   :  { %v1416_v60 = vmul.f32 %v1414_v14, %v3692_v37  ;;  %v2208_v14 = vld [vmem:[%s4002_s8] ss:$0 sm:$0xff] }
 0x718   :  { %v3767_v18 = vadd.f32 %v1417_v16, %v1416_v60 }
 0x71a   :  { %2347 = vtanh.f32 %v3767_v18 }
 0x727   :  { %v2348_v22 = vpop.eup %2347 }
 0x728   :  { %v1422_v23 = vmul.f32 %v2348_v22, %v1420_v21 }
 0x72a   :  { %1490 = vmatmul.mubr.f32.vlgmr.msra.gmra.mxu0 %v1422_v23  ;;  %1561 = vmatmul.mubr.f32.vlgmr.msra.gmra.mxu1 %v1422_v23 }
 0x72b   :  { %2240 = vmatpush3.msra.mxu0 %v1625_v24  ;;  %2271 = vmatprep.mubr.msk.f32.mxu0 %vm2449_vm0, %v4183_v61  ;;  %v1967_v24 = vld [vmem:[%s4005_s11 + $0x20] sm:$0xff] }
 0x72c   :  { %2241 = vmatprep.subr.mxu0 %v4183_v61  ;;  %2281 = vmatprep.mubr.msk.f32.mxu1 %vm2449_vm0, %v4183_v61 }
 0x72d   :  { %2242 = vmatpush3.msra.mxu0 %v1624_v25  ;;  %2280 = vmatpush3.msk.msra.mxu1 %vm1804_vm3, %v1792_v47  ;;  %v1966_v25 = vld [vmem:[%s4005_s11 + $0x18] sm:$0xff] }
 0x72e   :  { %2243 = vmatprep.subr.mxu0 %v4183_v61  ;;  %2284 = vmatprep.subr.mxu1 %v4183_v61 }
 0x72f   :  { %2244 = vmatpush3.msra.mxu0 %v1623_v26  ;;  %v1965_v26 = vld [vmem:[%s4005_s11 + $0x10] sm:$0xff] }
 0x730   :  { %2245 = vmatprep.subr.mxu0 %v4183_v61 }
 0x731   :  { %2246 = vmatpush3.msra.mxu0 %v1622_v27  ;;  %v1964_v27 = vld [vmem:[%s4005_s11 + $0x8] sm:$0xff] }
 0x732   :  { %2247 = vmatprep.subr.mxu0 %v4183_v61 }
 0x733   :  { %2248 = vmatpush3.msra.mxu0 %v1621_v28  ;;  %v1963_v28 = vld [vmem:[%s4005_s11] sm:$0xff] }
 0x734   :  { %2249 = vmatprep.subr.mxu0 %v4183_v61 }
 0x735   :  { %2250 = vmatpush3.msra.mxu0 %v1620_v29  ;;  %v2075_v29 = vld [vmem:[%s4007_s13 + $0x78] sm:$0xff] }
 0x736   :  { %2251 = vmatprep.subr.mxu0 %v4183_v61 }
 0x737   :  { %2252 = vmatpush3.msra.mxu0 %v1619_v30  ;;  %v2074_v30 = vld [vmem:[%s4007_s13 + $0x70] sm:$0xff] }
 0x738   :  { %2253 = vmatprep.subr.mxu0 %v4183_v61 }
 0x739   :  { %2254 = vmatpush3.msra.mxu0 %v1618_v31  ;;  %v2073_v31 = vld [vmem:[%s4007_s13 + $0x68] sm:$0xff] }
 0x73a   :  { %2255 = vmatprep.subr.mxu0 %v4183_v61 }
 0x73b   :  { %2256 = vmatpush3.msra.mxu0 %v1617_v32  ;;  %v2072_v32 = vld [vmem:[%s4007_s13 + $0x60] sm:$0xff] }
 0x73c   :  { %2257 = vmatprep.subr.mxu0 %v4183_v61 }
 0x73d   :  { %2258 = vmatpush3.msra.mxu0 %v1616_v33  ;;  %v2071_v33 = vld [vmem:[%s4007_s13 + $0x58] sm:$0xff] }
 0x73e   :  { %2259 = vmatprep.subr.mxu0 %v4183_v61 }
 0x73f   :  { %2260 = vmatpush3.msra.mxu0 %v1615_v36  ;;  %v2070_v36 = vld [vmem:[%s4007_s13 + $0x50] sm:$0xff] }
 0x740   :  { %2261 = vmatprep.subr.mxu0 %v4183_v61 }
 0x741   :  { %2262 = vmatpush3.msra.mxu0 %v1614_v44  ;;  %v2069_v44 = vld [vmem:[%s4007_s13 + $0x48] sm:$0xff] }
 0x742   :  { %2263 = vmatprep.subr.mxu0 %v4183_v61 }
 0x743   :  { %2264 = vmatpush3.msra.mxu0 %v1613_v19  ;;  %v2068_v19 = vld [vmem:[%s4007_s13 + $0x40] sm:$0xff] }
 0x744   :  { %2265 = vmatprep.subr.mxu0 %v4183_v61 }
 0x745   :  { %2266 = vmatpush3.msra.mxu0 %v1612_v20  ;;  %v2067_v20 = vld [vmem:[%s4007_s13 + $0x38] sm:$0xff] }
 0x746   :  { %2267 = vmatprep.subr.mxu0 %v4183_v61 }
 0x747   :  { %2268 = vmatpush3.msra.mxu0 %v1611_v39  ;;  %v2066_v39 = vld [vmem:[%s4007_s13 + $0x30] sm:$0xff] }
 0x748   :  { %2269 = vmatprep.subr.mxu0 %v4183_v61 }
 0x749   :  { %2270 = vmatpush3.msra.mxu0 %v1610_v38  ;;  %v2065_v38 = vld [vmem:[%s4007_s13 + $0x28] sm:$0xff] }
 0x74a   :  { %2274 = vmatprep.subr.mxu0 %v4183_v61 }
 0x7ea   :  { %v1491_v40 = vpop.f32.mrf.mxu0  ;;  %v1562_v42 = vpop.f32.mrf.mxu1 }
 0x7ec   :  { %v1493_v37 = vpop.f32.mrf.mxu0  ;;  %v1564_v43 = vpop.f32.mrf.mxu1 }
 0x7ed   :  { %v1571_v35 = vcombine.low %v1491_v40, %v1493_v37  ;;  %v1572_v34 = vcombine.low %v1562_v42, %v1564_v43  ;;  %v2064_v40 = vld [vmem:[%s4007_s13 + $0x20] sm:$0xff]  ;;  %v2063_v42 = vld [vmem:[%s4007_s13 + $0x18] sm:$0xff]  ;;  %v2062_v37 = vld [vmem:[%s4007_s13 + $0x10] sm:$0xff] }
 0x7ee   :  { %v2061_v43 = vld [vmem:[%s4007_s13 + $0x8] sm:$0xff] }
 0x7ef   :  { %v1579_v17 = vrot.slane %v1571_v35, %v4112_v52  ;;  %v1586_v56 = vrot.slane %v1572_v34, %v4112_v52  ;;  %v2060_v35 = vld [vmem:[%s4007_s13] sm:$0xff] }
 0x7f0   :  { %v2211_v34 = vld [vmem:[%s4004_s10] ss:$0 sm:$0xff] }
 0x7f1   :  { %v1587_v54 = vcombine.low %v1579_v17, %v1586_v56 }
 0x7f3   :  { %v1589_v57 = vadd.f32 %v2202_v59, %v1587_v54 }
 0x7f5   :  { %v2203_v55 = vmul.f32 -1.442695, %v1589_v57  ;;  %v1597_v48 = vrot.slane %v1589_v57, 6  ;;  %v2079_v57 = vld [vmem:[%s4007_s13 + $0x98] sm:$0xff] }
 0x7f7   :  { %2349 = vpow2.f32 %v2203_v55  ;;  %v2078_v55 = vld [vmem:[%s4007_s13 + $0x90] sm:$0xff] }
 0x804   :  { %v2350_v53 = vpop.eup %2349 }
 0x805   :  { %v1593_v49 = vadd.f32 1.0, %v2350_v53  ;;  %v2077_v53 = vld [vmem:[%s4007_s13 + $0x88] sm:$0xff] }
 0x807   :  { %2351 = vrcp.f32 %v1593_v49  ;;  %v2076_v49 = vld [vmem:[%s4007_s13 + $0x80] sm:$0xff] }
 0x808   :  { %2353 = vtanh.f32 %v1597_v48  ;;  %v4185_v48 = vld [vmem:[#allocation23_spill] sm:$0xff] }
 0x814   :  { %v2352_v63 = vpop.eup %2351 }
 0x815   :  { %v1601_v1 = vrot.slane %v2352_v63, 2  ;;  %v2354_v58 = vpop.eup %2353  ;;  %v1607_v50 = vrot.slane %v2352_v63, 4 }
 0x816   :  { %v1604_v51 = vmul.f32 %v2354_v58, %v2352_v63  ;;  %v1975_v63 = vsub.s32 0, %v4185_v48  ;;  %v1979_v58 = vsub.s32 1, %v4185_v48 }
 0x817   :  { %v1603_v0 = vmul.f32 %v1601_v1, %v3767_v18  ;;  %v1971_v1 = vld [vmem:[%s4006_s12] sm:$0x3]  ;;  %s2450_s12 = smov [#allocation2]  }
 0x819   :  { %v1605_v52 = vadd.f32 %v1604_v51, %v1603_v0  ;;  %v1976_v51 = vrot.slane %v1971_v1, %v1975_v63  ;;  %v1980_v0 = vrot.slane %v1971_v1, %v1979_v58 }
 0x81b   :  { %2355 = vtanh.f32 %v1605_v52 }
 0x828   :  { %v2356_v62 = vpop.eup %2355 }
 0x829   :  { %v1609_v41 = vmul.f32 %v2356_v62, %v1607_v50 }
 0x82b   :  { %2272 = vmatmul.mubr.f32.vlgmr.msra.gmra.mxu0 %v1609_v41 }
 0x82c   :  { %2275 = vmatpush3.msk.msra.mxu0 %vm1717_vm1, %v1705_v45  ;;  %2276 = vmatprep.mubr.msk.f32.mxu0 %vm2449_vm0, %v4183_v61 }
 0x82d   :  { %2011 = vmatprep.subr.mxu0 %v1970_v10 }
 0x82f   :  { %2277 = vmatmul.mubr.msk.f32.vlgmr.msra.gmra.mxu0 %vm1713_vm2, %v1704_v46 }
 0x830   :  { %2051 = vmatprep.mubr.f32.mxu0 %v4183_v61  ;;  %2012 = vmatpush1.msra.mxu0 %v1969_v11 }
 0x831   :  { %2013 = vmatprep.subr.mxu0 %v1968_v12 }
 0x832   :  { %2014 = vmatpush1.msra.mxu0 %v1967_v24 }
 0x833   :  { %2015 = vmatprep.subr.mxu0 %v1966_v25 }
 0x834   :  { %2016 = vmatpush1.msra.mxu0 %v1965_v26 }
 0x835   :  { %2017 = vmatprep.subr.mxu0 %v1964_v27 }
 0x836   :  { %2018 = vmatpush1.msra.mxu0 %v1963_v28 }
 0x8eb   :  { %v1699_v2 = vpop.f32.mrf.mxu0 }
 0x8ec   :  { %v1700_v15 = vadd.f32 %v2204_v13, %v1699_v2 }
 0x8ed   :  { %v2273_v3 = vpop.f32.mrf.mxu0 }
 0x8ee   :  { %v1703_v21 = vmax.f32 %v1700_v15, 0.0 }
 0x8ef   :  { %v1787_v5 = vpop.f32.mrf.mxu0 }
 0x8f0   :  { %v1788_v6 = vadd.f32 %v2205_v4, %v1787_v5 }
 0x8f1   :  { %v2278_v7 = vpop.f32.mrf.mxu0 }
 0x8f2   :  { %v1791_v8 = vmax.f32 %v1788_v6, 0.0 }
 0x8f4   :  { %2282 = vmatmul.mubr.msk.f32.vlgmr.msra.gmra.mxu1 %vm1800_vm4, %v1791_v8 }
 0x8f5   :  { %2286 = vmatprep.mubr.msk.f32.mxu1 %vm2449_vm0, %v4183_v61  ;;  %2285 = vmatpush3.msra.mxu1 %v1880_v9 }
 0x8f6   :  { %2090 = vmatprep.subr.mxu1 %v4183_v61 }
 0x9b4   :  { %v1874_v16 = vpop.f32.mrf.mxu1 }
 0x9b5   :  { %v1875_v60 = vadd.f32 %v2208_v14, %v1874_v16 }
 0x9b6   :  { %v2283_v18 = vpop.f32.mrf.mxu1 }
 0x9b7   :  { %v1878_v22 = vmax.f32 %v1875_v60, 0.0 }
 0x9b9   :  { %v1879_v23 = vadd.f32 %v1878_v22, %v1703_v21 }
 0x9bb   :  { %2287 = vmatmul.mubr.msk.f32.vlgmr.msra.gmra.mxu1 %vm1888_vm5, %v1879_v23 }
 0x9bc   :  { %2091 = vmatpush1.msra.mxu1 %v2075_v29 }
 0x9bd   :  { %2092 = vmatprep.subr.mxu1 %v4183_v61 }
 0x9be   :  { %2093 = vmatpush1.msra.mxu1 %v2074_v30 }
 0x9bf   :  { %2094 = vmatprep.subr.mxu1 %v4183_v61 }
 0x9c0   :  { %2095 = vmatpush1.msra.mxu1 %v2073_v31 }
 0x9c1   :  { %2096 = vmatprep.subr.mxu1 %v4183_v61 }
 0x9c2   :  { %2097 = vmatpush1.msra.mxu1 %v2072_v32 }
 0x9c3   :  { %2098 = vmatprep.subr.mxu1 %v4183_v61 }
 0x9c4   :  { %2099 = vmatpush1.msra.mxu1 %v2071_v33 }
 0x9c5   :  { %2100 = vmatprep.subr.mxu1 %v4183_v61 }
 0x9c6   :  { %2101 = vmatpush1.msra.mxu1 %v2070_v36 }
 0x9c7   :  { %2102 = vmatprep.subr.mxu1 %v4183_v61 }
 0x9c8   :  { %2103 = vmatpush1.msra.mxu1 %v2069_v44 }
 0x9c9   :  { %2104 = vmatprep.subr.mxu1 %v4183_v61 }
 0x9ca   :  { %2105 = vmatpush1.msra.mxu1 %v2068_v19 }
 0x9cb   :  { %2106 = vmatprep.subr.mxu1 %v4183_v61 }
 0x9cc   :  { %2107 = vmatpush1.msra.mxu1 %v2067_v20 }
 0x9cd   :  { %2108 = vmatprep.subr.mxu1 %v4183_v61 }
 0x9ce   :  { %2109 = vmatpush1.msra.mxu1 %v2066_v39 }
 0x9cf   :  { %2110 = vmatprep.subr.mxu1 %v4183_v61 }
 0x9d0   :  { %2111 = vmatpush1.msra.mxu1 %v2065_v38 }
 0x9d1   :  { %2112 = vmatprep.subr.mxu1 %v4183_v61 }
 0x9d2   :  { %2113 = vmatpush1.msra.mxu1 %v2064_v40 }
 0x9d3   :  { %2114 = vmatprep.subr.mxu1 %v4183_v61 }
 0x9d4   :  { %2115 = vmatpush1.msra.mxu1 %v2063_v42 }
 0x9d5   :  { %2116 = vmatprep.subr.mxu1 %v4183_v61 }
 0x9d6   :  { %2117 = vmatpush1.msra.mxu1 %v2062_v37 }
 0x9d7   :  { %2118 = vmatprep.subr.mxu1 %v4183_v61 }
 0x9d8   :  { %2119 = vmatpush1.msra.mxu1 %v2061_v43 }
 0x9d9   :  { %2120 = vmatprep.subr.mxu1 %v4183_v61 }
 0x9da   :  { %2121 = vmatpush1.msra.mxu1 %v2060_v35 }
 0x9db   :  { %2146 = vmatprep.subr.mxu1 %v4183_v61 }
 0x9dc   :  { %2147 = vmatpush2.msra.mxu1 %v2079_v57 }
 0x9dd   :  { %2148 = vmatprep.subr.mxu1 %v4183_v61 }
 0x9de   :  { %2149 = vmatpush2.msra.mxu1 %v2078_v55 }
 0x9df   :  { %2150 = vmatprep.subr.mxu1 %v4183_v61 }
 0x9e0   :  { %2151 = vmatpush2.msra.mxu1 %v2077_v53 }
 0x9e1   :  { %2152 = vmatprep.subr.mxu1 %v4183_v61  ;;  %v2214_v61 = vld [vmem:[%s4008_s14] ss:$0 sm:$0xff]  ;;  %s2181_s14 = sshll.u32 %s2450_s12, 4  ;;  %s2182_s14 = int_to_ptr.vmem [resolvable:$true] %s2181_s14 }
 0x9e2   :  { %2153 = vmatpush2.msra.mxu1 %v2076_v49  ;;  %s2425_s18 = scalar_lea.vmem %s2182_s14, 32  ;;  %p2430_p1 = scmp.lt.s32.totalorder %s2182_s14, %s2182_s14 }
 0x9e3   :  { %p2426_p0 = scmp.ne.s32.totalorder %s2182_s14, %s2425_s18  ;;  %p2431_p2 = scmp.lt.s32.totalorder %s2425_s18, %s2425_s18 }
 0x9e5   :  { %p2432_p3 = por %p2431_p2, %p2430_p1 }
 0x9e7   :  { %p2433_p4 = pnand %p2432_p3, %p2426_p0 }
 0xa7b   :  { %v1958_v17 = vpop.f32.mrf.mxu1 }
 0xa7c   :  { %v1959_v56 = vadd.f32 %v2211_v34, %v1958_v17 }
 0xa7d   :  { %v2288_v59 = vpop.f32.mrf.mxu1 }
 0xa7e   :  { %v1962_v54 = vmax.f32 %v1959_v56, 0.0 }
 0xa80   :  { %2213 = vmatmul.mubr.msk.f32.vlgmr.msra.gmra.mxu0 %vm1983_vm6, %v1962_v54 }
 0xb40   :  { %v2053_v52 = vpop.f32.mrf.mxu0 }
 0xb41   :  { %v2054_v50 = vadd.f32 %v2053_v52, %v1976_v51 }
 0xb42   :  { %v2055_v62 = vpop.f32.mrf.mxu0 }
 0xb43   :  { %v2056_v41 = vadd.f32 %v2055_v62, %v1980_v0  ;;  %v2058_v46 = vmax.f32 %v2054_v50, 0.0 }
 0xb45   :  { %v2059_v45 = vmax.f32 %v2056_v41, 0.0 }
 0xb47   :  { %2215 = vmatprep.mubr.msk.f32.mxu1 %vm1983_vm6, %v2059_v45 }
 0xb48   :  { %2155 = vmatmul.mubr.f32.vlgmr.msra.gmra.mxu1 %v2058_v46 }
 0xc08   :  { %v2156_v47 = vpop.f32.mrf.mxu1 }
 0xc09   :  { %v2157_v2 = vadd.f32 %v2214_v61, %v2156_v47 }
 0xc0a   :  { %v2158_v3 = vpop.f32.mrf.mxu1 }
 0xc0b   :  { %v2160_v4 = vmax.f32 %v2157_v2, 0.0 }
 0xc0d   :  { %v2162_v5 = vsel %vm2161_vm7, %v2160_v4, -inf }
 0xc0e   :  { %2163 = vmax.xlane.f32.xlu0 %v2162_v5 }
 0xc97   :  { %v2164_v6 = vpop.xlane.xlu0 %2163 }
 0xc98   :  { %v2165_v7 = vsub.f32 %v2160_v4, %v2164_v6 }
 0xc9a   :  { %v2166_v8 = vmul.f32 1.442695, %v2165_v7 }
 0xc9c   :  { %2357 = vpow2.f32 %v2166_v8 }
 0xca9   :  { %v2358_v9 = vpop.eup %2357 }
 0xcaa   :  { %v2168_v10 = vsel %vm2161_vm7, %v2358_v9, 0.0 }
 0xcab   :  { %2169 = vadd.xlane.f32.xlu0 %v2168_v10 }
 0xd34   :  { %v2170_v11 = vpop.xlane.xlu0 %2169 }
 0xd35   :  { %2359 = vlog2.f32 %v2170_v11 }
 0xd42   :  { %v2360_v12 = vpop.eup %2359 }
 0xd43   :  { %v2172_v13 = vmul.f32 0.6931472, %v2360_v12 }
 0xd45   :  { %v2173_v14 = vsub.f32 %v2165_v7, %v2172_v13 }
 0xd47   :  { %2174 = vst.msk [vmem:[#allocation2] sm:$0x3] %vm2161_vm7, %v2173_v14 }
 0xd48   :  { %2436 = shalt.err (!%p2433_p4)
}
 0xd49   :  { %2184 = dma.vmem_to_hbm [thread:$0]  %s2182_s14, 32, %s4009_s15, [#allocation3]  }
 0xd4a   :  { %2445 = dma.done.wait [#allocation3], 32  }
 0xd4b   :  { %2446 = vsyncadd [#allocation3], 4294967264 }
 0xd4c   :  { %2188 = vsyncpa [#allocation3], 1 }

</bundles_post_ra>
